<compile_context>
chip_gen: v7x
topology: tpu7x:2x2x1
jax: 0.10.0
libtpu: 0.0.40
codegen_flags: <defaults>
</compile_context>

<pallas_src>
import math

import jax
import jax.numpy as jnp
from jax.experimental import pallas as pl
from jax.experimental.pallas import tpu as pltpu  # noqa: F401  (kept for TPU-targeted variants)

# ---- small BERT-like config -------------------------------------------------
B, S, H = 2, 8, 32          # batch, seq, hidden
NH = 4                      # attention heads
HD = H // NH                # head dim
I = 64                      # FFN intermediate size
L = 2                       # encoder layers
V = 100                     # vocab size
VP = 128                    # vocab / lane-pad width (full lane width)
P = 16                      # max position embeddings
TT = 2                      # token type vocab
TOK = B * S                 # flattened token count
EPS = 1e-12
SCALE = 1.0 / math.sqrt(HD)

# Row indices inside the packed, lane-padded f32 vector slabs.
(G_EMB_G, G_EMB_B, G_TYPE0, G_TYPE1, G_POOL_B,
 G_MLM_B, G_MLM_G, G_MLM_B2, G_NSP_B, G_DEC_B) = range(10)
(L_BQ, L_BK, L_BV, L_BO, L_LN1G, L_LN1B, L_B1, L_B2, L_LN2G, L_LN2B) = range(10)


# ---- in-kernel math helpers --------------------------------------------------
def _gelu(x):
    # tanh-approx GELU: routes the transcendental to the EUP slot (VALU is the tight slot).
    return 0.5 * x * (1.0 + jnp.tanh(0.7978845608028654 * (x + 0.044715 * x * x * x)))


def _layer_norm(x, g, b):
    mu = jnp.mean(x, axis=-1, keepdims=True)
    var = jnp.mean(jnp.square(x - mu), axis=-1, keepdims=True)
    return (x - mu) * jax.lax.rsqrt(var + EPS) * g + b


def _row(slab, r, w):
    # One packed parameter row: static slice -> (1, w).
    return slab[r:r + 1, :w]


# ---- fused kernel: embeddings + L encoder layers + pretraining heads ---------
def fused_bert_kernel(ids_ref, tt_ref, bias_ref, pos_ref,
                      wemb_ref, decw_ref, gvec_ref,
                      wq_ref, wk_ref, wv_ref, wo_ref, w1_ref, w2_ref, lvec_ref,
                      poolw_ref, nspw_ref, mlmw_ref,
                      hs_ref, pred_ref, nsp_ref):
    gv = gvec_ref[...]                                               # (10, VP) f32

    # ---------------- embeddings + LayerNorm ---------------------------------
    ids = ids_ref[...]                                               # (TOK, 1) int32
    lane = jax.lax.broadcasted_iota(jnp.int32, (TOK, VP), 1)
    onehot = jnp.where(ids == lane, 1.0, 0.0).astype(jnp.bfloat16)   # (TOK, VP)
    e = jnp.dot(onehot, wemb_ref[...], preferred_element_type=jnp.float32)
    tt = tt_ref[...]                                                 # (TOK, 1) f32 in {0,1}
    e = (e + pos_ref[...]
         + _row(gv, G_TYPE0, H) * (1.0 - tt) + _row(gv, G_TYPE1, H) * tt)
    x = _layer_norm(e, _row(gv, G_EMB_G, H), _row(gv, G_EMB_B, H))
    hs_ref[0] = x                                                    # embeddings output

    bias = bias_ref[...]                                             # (TOK, TOK) additive

    # ---------------- L encoder layers (statically unrolled) -----------------
    for l in range(L):
        lv = lvec_ref[l]                                             # (10, VP) f32 slab
        xb = x.astype(jnp.bfloat16)

        # Whole-H projections (3 matmuls/layer instead of 12 K=8 head dots).
        q = jnp.dot(xb, wq_ref[l], preferred_element_type=jnp.float32) + _row(lv, L_BQ, H)
        k = jnp.dot(xb, wk_ref[l], preferred_element_type=jnp.float32) + _row(lv, L_BK, H)
        v = jnp.dot(xb, wv_ref[l], preferred_element_type=jnp.float32) + _row(lv, L_BV, H)
        q = q * SCALE                                                # fold 1/sqrt(HD) once
        qb = q.astype(jnp.bfloat16)
        kb = k.astype(jnp.bfloat16)
        vb = v.astype(jnp.bfloat16)

        ctx_heads = []
        for n in range(NH):                                          # static head loop
            hsl = slice(n * HD, (n + 1) * HD)                        # lane-group slice
            s = jnp.dot(qb[:, hsl], kb[:, hsl].T,
                        preferred_element_type=jnp.float32) + bias
            s = s - jnp.max(s, axis=-1, keepdims=True)
            p = jnp.exp(s)
            p = p * pl.reciprocal(jnp.sum(p, axis=-1, keepdims=True), approx=True)
            ctx_heads.append(jnp.dot(p.astype(jnp.bfloat16), vb[:, hsl],
                                     preferred_element_type=jnp.float32))
        ctx = jnp.concatenate(ctx_heads, axis=-1)                    # (TOK, H) lane-packed
        attn = jnp.dot(ctx.astype(jnp.bfloat16), wo_ref[l],
                       preferred_element_type=jnp.float32) + _row(lv, L_BO, H)

        x1 = _layer_norm(x + attn, _row(lv, L_LN1G, H), _row(lv, L_LN1B, H))
        ff = _gelu(jnp.dot(x1.astype(jnp.bfloat16), w1_ref[l],
                           preferred_element_type=jnp.float32) + _row(lv, L_B1, I))
        ff = jnp.dot(ff.astype(jnp.bfloat16), w2_ref[l],
                     preferred_element_type=jnp.float32) + _row(lv, L_B2, H)
        x = _layer_norm(x1 + ff, _row(lv, L_LN2G, H), _row(lv, L_LN2B, H))
        hs_ref[l + 1] = x

    # ---------------- pretraining heads --------------------------------------
    xb = x.astype(jnp.bfloat16)
    # Pooler + NSP on the [CLS] rows: static sublane-aligned slices (rows 0 and S).
    cls = jnp.concatenate([x[b * S:b * S + 1, :] for b in range(B)], axis=0)   # (B, H)
    pooled = jnp.tanh(jnp.dot(cls.astype(jnp.bfloat16), poolw_ref[...],
                              preferred_element_type=jnp.float32) + _row(gv, G_POOL_B, H))
    nsp_ref[...] = jnp.dot(pooled.astype(jnp.bfloat16), nspw_ref[...],
                           preferred_element_type=jnp.float32) + _row(gv, G_NSP_B, VP)
    # MLM head: dense -> GELU -> LayerNorm -> tied decoder (lane-padded to 128 vocab).
    t = _gelu(jnp.dot(xb, mlmw_ref[...], preferred_element_type=jnp.float32)
              + _row(gv, G_MLM_B, H))
    t = _layer_norm(t, _row(gv, G_MLM_G, H), _row(gv, G_MLM_B2, H))
    pred_ref[...] = jnp.dot(t.astype(jnp.bfloat16), decw_ref[...],
                            preferred_element_type=jnp.float32) + _row(gv, G_DEC_B, VP)


# ---- one-time parameter layout plumbing (free, outside the kernel) ------------
def prepare_params(params):
    f32, bf16 = jnp.float32, jnp.bfloat16
    lp = params['layers']

    def row(v):                       # flat vector -> one (1, VP) lane-padded f32 row
        v = jnp.asarray(v, f32).reshape(1, -1)
        return jnp.pad(v, ((0, 0), (0, VP - v.shape[1])))

    def lrow(v):                      # (L, 1, W) -> (L, 1, VP) lane-padded f32 row
        return jnp.pad(v.astype(f32), ((0, 0), (0, 0), (0, VP - v.shape[-1])))

    # Global vector slab: rows ordered to match the G_* indices.
    gvec = jnp.concatenate([
        row(params['emb_ln_g']), row(params['emb_ln_b']),
        row(params['type_emb'][0]), row(params['type_emb'][1]),
        row(params['pool_b']), row(params['mlm_b']),
        row(params['mlm_ln_g']), row(params['mlm_ln_b']),
        row(params['nsp_b']), row(params['dec_b']),
    ], axis=0)                                                       # (10, VP)

    # Per-layer vector slab: rows ordered to match the L_* indices.
    lvec = jnp.concatenate([
        lrow(lp['bq']), lrow(lp['bk']), lrow(lp['bv']), lrow(lp['bo']),
        lrow(lp['ln1_g']), lrow(lp['ln1_b']),
        lrow(lp['b1']), lrow(lp['b2']),
        lrow(lp['ln2_g']), lrow(lp['ln2_b']),
    ], axis=1)                                                       # (L, 10, VP)

    wemb_pad = jnp.pad(params['word_emb'], ((0, VP - V), (0, 0)))    # (VP, H)
    return dict(
        pos_tiled=jnp.tile(params['pos_emb'][:S], (B, 1)).astype(f32),   # (TOK, H)
        wemb_pad=wemb_pad.astype(bf16),
        dec_w=wemb_pad.T.astype(bf16),                               # (H, VP) tied decoder
        gvec=gvec, lvec=lvec,
        wq=lp['wq'].astype(bf16), wk=lp['wk'].astype(bf16), wv=lp['wv'].astype(bf16),
        wo=lp['wo'].astype(bf16),
        w1=lp['w1'].astype(bf16), w2=lp['w2'].astype(bf16),
        pool_w=params['pool_w'].astype(bf16),
        nsp_w=jnp.pad(params['nsp_w'], ((0, 0), (0, VP - 2))).astype(bf16),
        mlm_w=params['mlm_w'].astype(bf16),
    )


# ---- forward pass (AutoForUtteranceEncoding.forward) --------------------------
def encode(prep, input_ids, token_type_ids, attention_mask):
    f32 = jnp.float32
    ids_flat = input_ids.reshape(TOK, 1).astype(jnp.int32)
    tt_flat = token_type_ids.reshape(TOK, 1).astype(f32)

    # Additive attention bias on the flattened (B*S) token axis:
    # padding-key bias (HF: (1-mask)*large_negative) + block-diagonal batch separation.
    # TODO(synk): for production B*S this O((B*S)^2) bias should be built in-kernel from
    #             the key_bias vector and batch made a "parallel" grid axis (2nd v7x core);
    #             at B*S=16 the materialized 1 KiB form plus a single grid step is cheaper.
    key_bias = ((1.0 - attention_mask.astype(f32)) * -1e9).reshape(TOK)
    batch_ids = jnp.repeat(jnp.arange(B, dtype=jnp.int32), S)
    same_batch = batch_ids[:, None] == batch_ids[None, :]
    bias2d = jnp.where(same_batch, key_bias[None, :], -1e9).astype(f32)   # (TOK, TOK)

    out_shape = (jax.ShapeDtypeStruct((L + 1, TOK, H), f32),   # hidden states (emb at idx 0)
                 jax.ShapeDtypeStruct((TOK, VP), f32),         # MLM logits (lane-padded)
                 jax.ShapeDtypeStruct((B, VP), f32))           # NSP logits (lane-padded)

    # Single invocation, no grid: all operands are full-array VMEM blocks.
    hs, pred_pad, nsp_pad = pl.pallas_call(
        fused_bert_kernel,
        out_shape=out_shape,
    )(ids_flat, tt_flat, bias2d, prep['pos_tiled'],
      prep['wemb_pad'], prep['dec_w'], prep['gvec'],
      prep['wq'], prep['wk'], prep['wv'], prep['wo'], prep['w1'], prep['w2'], prep['lvec'],
      prep['pool_w'], prep['nsp_w'], prep['mlm_w'])

    hidden_states = tuple(hs[i].reshape(B, S, H) for i in range(L + 1))
    return {
        'prediction_logits': pred_pad.reshape(B, S, VP)[:, :, :V],
        'seq_relationship_logits': nsp_pad[:, :2],
        'hidden_states': hidden_states,
        'last_hidden_state': hidden_states[-1],
        'attentions': None,          # output_attentions=False
    }


# ---- deterministic parameter init ---------------------------------------------
def init_params(key):
    keys = iter(jax.random.split(key, 64))

    def w(shape, scale=0.02):
        return (scale * jax.random.normal(next(keys), shape)).astype(jnp.float32)

    def zeros(shape):
        return jnp.zeros(shape, jnp.float32)

    def ones(shape):
        return jnp.ones(shape, jnp.float32)

    layers = dict(
        wq=w((L, H, H)), bq=zeros((L, 1, H)),
        wk=w((L, H, H)), bk=zeros((L, 1, H)),
        wv=w((L, H, H)), bv=zeros((L, 1, H)),
        wo=w((L, H, H)), bo=zeros((L, 1, H)),
        ln1_g=ones((L, 1, H)), ln1_b=zeros((L, 1, H)),
        w1=w((L, H, I)), b1=zeros((L, 1, I)),
        w2=w((L, I, H)), b2=zeros((L, 1, H)),
        ln2_g=ones((L, 1, H)), ln2_b=zeros((L, 1, H)),
    )
    return dict(
        word_emb=w((V, H)), pos_emb=w((P, H)), type_emb=w((TT, H)),
        emb_ln_g=ones((1, H)), emb_ln_b=zeros((1, H)),
        layers=layers,
        pool_w=w((H, H)), pool_b=zeros((1, H)),
        nsp_w=w((H, 2)), nsp_b=zeros((1, 2)),
        mlm_w=w((H, H)), mlm_b=zeros((1, H)),
        mlm_ln_g=ones((1, H)), mlm_ln_b=zeros((1, H)),
        dec_b=zeros((1, V)),
    )


if __name__ == "__main__":
    key = jax.random.PRNGKey(0)
    kp, ki = jax.random.split(key, 2)
    params = init_params(kp)
    prep = prepare_params(params)        # one-time layout plumbing + bf16 casts

    input_ids = jax.random.randint(ki, (B, S), 0, V, dtype=jnp.int32)
    token_type_ids = jnp.concatenate(
        [jnp.zeros((B, S // 2), jnp.int32), jnp.ones((B, S - S // 2), jnp.int32)], axis=1)
    attention_mask = jnp.array([[1] * S, [1] * (S - 2) + [0] * 2], dtype=jnp.int32)

    out = jax.jit(encode)(prep, input_ids, token_type_ids, attention_mask)
    jax.block_until_ready(out)
    print("KERNEL_OK")
</pallas_src>

<mosaic_0001>
module attributes {stable_mosaic.version = 11 : i64} {
  func.func @fused_bert_kernel(%arg0: memref<16x1xi32, #tpu.memory_space<vmem>>, %arg1: memref<16x1xf32, #tpu.memory_space<vmem>>, %arg2: memref<16x16xf32, #tpu.memory_space<vmem>>, %arg3: memref<16x32xf32, #tpu.memory_space<vmem>>, %arg4: memref<128x32xbf16, #tpu.memory_space<vmem>>, %arg5: memref<32x128xbf16, #tpu.memory_space<vmem>>, %arg6: memref<10x128xf32, #tpu.memory_space<vmem>>, %arg7: memref<2x32x32xbf16, #tpu.memory_space<vmem>>, %arg8: memref<2x32x32xbf16, #tpu.memory_space<vmem>>, %arg9: memref<2x32x32xbf16, #tpu.memory_space<vmem>>, %arg10: memref<2x32x32xbf16, #tpu.memory_space<vmem>>, %arg11: memref<2x32x64xbf16, #tpu.memory_space<vmem>>, %arg12: memref<2x64x32xbf16, #tpu.memory_space<vmem>>, %arg13: memref<2x10x128xf32, #tpu.memory_space<vmem>>, %arg14: memref<32x32xbf16, #tpu.memory_space<vmem>>, %arg15: memref<32x128xbf16, #tpu.memory_space<vmem>>, %arg16: memref<32x32xbf16, #tpu.memory_space<vmem>>, %arg17: memref<3x16x32xf32, #tpu.memory_space<vmem>>, %arg18: memref<16x128xf32, #tpu.memory_space<vmem>>, %arg19: memref<2x128xf32, #tpu.memory_space<vmem>>) attributes {dimension_semantics = [], scalar_prefetch = 0 : i64, scratch_operands = 0 : i64, tpu.core_type = #tpu.core_type<tc>} {
    %c0 = arith.constant 0 : index
    %c0_0 = arith.constant 0 : index
    %0 = vector.load %arg6[%c0, %c0_0] : memref<10x128xf32, #tpu.memory_space<vmem>>, vector<10x128xf32>
    %c0_1 = arith.constant 0 : index
    %c0_2 = arith.constant 0 : index
    %1 = vector.load %arg0[%c0_1, %c0_2] : memref<16x1xi32, #tpu.memory_space<vmem>>, vector<16x1xi32>
    %2 = tpu.iota {dimensions = array<i32: 1>} : vector<16x128xi32>
    %3 = vector.broadcast %1 : vector<16x1xi32> to vector<16x128xi32>
    %4 = arith.cmpi eq, %3, %2 : vector<16x128xi32>
    %cst = arith.constant 1.000000e+00 : f32
    %cst_3 = arith.constant 0.000000e+00 : f32
    %5 = vector.broadcast %cst : f32 to vector<16x128xf32>
    %6 = vector.broadcast %cst_3 : f32 to vector<16x128xf32>
    %7 = arith.select %4, %5, %6 : vector<16x128xi1>, vector<16x128xf32>
    %8 = arith.truncf %7 : vector<16x128xf32> to vector<16x128xbf16>
    %c0_4 = arith.constant 0 : index
    %c0_5 = arith.constant 0 : index
    %9 = vector.load %arg4[%c0_4, %c0_5] : memref<128x32xbf16, #tpu.memory_space<vmem>>, vector<128x32xbf16>
    %cst_6 = arith.constant dense<0.000000e+00> : vector<16x32xf32>
    %10 = tpu.matmul %8, %9, %cst_6 {dimension_numbers = #tpu.dot_dimension_numbers<[1], [0], [0], [1], [0, 0, 1, 1], [], []>} : vector<16x128xbf16>, vector<128x32xbf16>, vector<16x32xf32> -> vector<16x32xf32>
    %c0_7 = arith.constant 0 : index
    %c0_8 = arith.constant 0 : index
    %11 = vector.load %arg1[%c0_7, %c0_8] : memref<16x1xf32, #tpu.memory_space<vmem>>, vector<16x1xf32>
    %c0_9 = arith.constant 0 : index
    %c0_10 = arith.constant 0 : index
    %12 = vector.load %arg3[%c0_9, %c0_10] : memref<16x32xf32, #tpu.memory_space<vmem>>, vector<16x32xf32>
    %13 = arith.addf %10, %12 : vector<16x32xf32>
    %14 = vector.extract_strided_slice %0 {offsets = [2, 0], sizes = [1, 32], strides = [1, 1]} : vector<10x128xf32> to vector<1x32xf32>
    %cst_11 = arith.constant 1.000000e+00 : f32
    %15 = vector.broadcast %cst_11 : f32 to vector<16x1xf32>
    %16 = arith.subf %15, %11 : vector<16x1xf32>
    %17 = vector.broadcast %14 : vector<1x32xf32> to vector<16x32xf32>
    %18 = vector.broadcast %16 : vector<16x1xf32> to vector<16x32xf32>
    %19 = arith.mulf %17, %18 : vector<16x32xf32>
    %20 = arith.addf %13, %19 : vector<16x32xf32>
    %21 = vector.extract_strided_slice %0 {offsets = [3, 0], sizes = [1, 32], strides = [1, 1]} : vector<10x128xf32> to vector<1x32xf32>
    %22 = vector.broadcast %21 : vector<1x32xf32> to vector<16x32xf32>
    %23 = vector.broadcast %11 : vector<16x1xf32> to vector<16x32xf32>
    %24 = arith.mulf %22, %23 : vector<16x32xf32>
    %25 = arith.addf %20, %24 : vector<16x32xf32>
    %26 = vector.extract_strided_slice %0 {offsets = [0, 0], sizes = [1, 32], strides = [1, 1]} : vector<10x128xf32> to vector<1x32xf32>
    %27 = vector.extract_strided_slice %0 {offsets = [1, 0], sizes = [1, 32], strides = [1, 1]} : vector<10x128xf32> to vector<1x32xf32>
    %cst_12 = arith.constant dense<0.000000e+00> : vector<16xf32>
    %28 = vector.multi_reduction <add>, %25, %cst_12 [1] : vector<16x32xf32> to vector<16xf32>
    %29 = vector.shape_cast %28 : vector<16xf32> to vector<16x1xf32>
    %cst_13 = arith.constant 3.200000e+01 : f32
    %30 = vector.broadcast %cst_13 : f32 to vector<16x1xf32>
    %31 = arith.divf %29, %30 : vector<16x1xf32>
    %32 = vector.broadcast %31 : vector<16x1xf32> to vector<16x32xf32>
    %33 = arith.subf %25, %32 : vector<16x32xf32>
    %34 = arith.mulf %33, %33 : vector<16x32xf32>
    %cst_14 = arith.constant dense<0.000000e+00> : vector<16xf32>
    %35 = vector.multi_reduction <add>, %34, %cst_14 [1] : vector<16x32xf32> to vector<16xf32>
    %36 = vector.shape_cast %35 : vector<16xf32> to vector<16x1xf32>
    %cst_15 = arith.constant 3.200000e+01 : f32
    %37 = vector.broadcast %cst_15 : f32 to vector<16x1xf32>
    %38 = arith.divf %36, %37 : vector<16x1xf32>
    %39 = vector.broadcast %31 : vector<16x1xf32> to vector<16x32xf32>
    %40 = arith.subf %25, %39 : vector<16x32xf32>
    %cst_16 = arith.constant 9.99999996E-13 : f32
    %41 = vector.broadcast %cst_16 : f32 to vector<16x1xf32>
    %42 = arith.addf %38, %41 : vector<16x1xf32>
    %43 = math.rsqrt %42 : vector<16x1xf32>
    %44 = vector.broadcast %43 : vector<16x1xf32> to vector<16x32xf32>
    %45 = arith.mulf %40, %44 : vector<16x32xf32>
    %46 = vector.broadcast %26 : vector<1x32xf32> to vector<16x32xf32>
    %47 = arith.mulf %45, %46 : vector<16x32xf32>
    %48 = vector.broadcast %27 : vector<1x32xf32> to vector<16x32xf32>
    %49 = arith.addf %47, %48 : vector<16x32xf32>
    %c0_17 = arith.constant 0 : index
    %c0_18 = arith.constant 0 : index
    %c0_19 = arith.constant 0 : index
    %50 = vector.load %arg17[%c0_17, %c0_18, %c0_19] : memref<3x16x32xf32, #tpu.memory_space<vmem>>, vector<1x16x32xf32>
    %51 = vector.shape_cast %50 : vector<1x16x32xf32> to vector<16x32xf32>
    %52 = vector.shape_cast %49 : vector<16x32xf32> to vector<1x16x32xf32>
    tpu.vector_store %arg17[%c0_17, %c0_18, %c0_19], %52 {strides = array<i32>} : memref<3x16x32xf32, #tpu.memory_space<vmem>>, vector<1x16x32xf32>,
    %c0_20 = arith.constant 0 : index
    %c0_21 = arith.constant 0 : index
    %53 = vector.load %arg2[%c0_20, %c0_21] : memref<16x16xf32, #tpu.memory_space<vmem>>, vector<16x16xf32>
    %c0_22 = arith.constant 0 : index
    %c0_23 = arith.constant 0 : index
    %c0_24 = arith.constant 0 : index
    %54 = vector.load %arg13[%c0_22, %c0_23, %c0_24] : memref<2x10x128xf32, #tpu.memory_space<vmem>>, vector<1x10x128xf32>
    %55 = vector.shape_cast %54 : vector<1x10x128xf32> to vector<10x128xf32>
    %56 = arith.truncf %49 : vector<16x32xf32> to vector<16x32xbf16>
    %c0_25 = arith.constant 0 : index
    %c0_26 = arith.constant 0 : index
    %c0_27 = arith.constant 0 : index
    %57 = vector.load %arg7[%c0_25, %c0_26, %c0_27] : memref<2x32x32xbf16, #tpu.memory_space<vmem>>, vector<1x32x32xbf16>
    %58 = vector.shape_cast %57 : vector<1x32x32xbf16> to vector<32x32xbf16>
    %cst_28 = arith.constant dense<0.000000e+00> : vector<16x32xf32>
    %59 = tpu.matmul %56, %58, %cst_28 {dimension_numbers = #tpu.dot_dimension_numbers<[1], [0], [0], [1], [0, 0, 1, 1], [], []>} : vector<16x32xbf16>, vector<32x32xbf16>, vector<16x32xf32> -> vector<16x32xf32>
    %60 = vector.extract_strided_slice %55 {offsets = [0, 0], sizes = [1, 32], strides = [1, 1]} : vector<10x128xf32> to vector<1x32xf32>
    %61 = vector.broadcast %60 : vector<1x32xf32> to vector<16x32xf32>
    %62 = arith.addf %59, %61 : vector<16x32xf32>
    %c0_29 = arith.constant 0 : index
    %c0_30 = arith.constant 0 : index
    %c0_31 = arith.constant 0 : index
    %63 = vector.load %arg8[%c0_29, %c0_30, %c0_31] : memref<2x32x32xbf16, #tpu.memory_space<vmem>>, vector<1x32x32xbf16>
    %64 = vector.shape_cast %63 : vector<1x32x32xbf16> to vector<32x32xbf16>
    %cst_32 = arith.constant dense<0.000000e+00> : vector<16x32xf32>
    %65 = tpu.matmul %56, %64, %cst_32 {dimension_numbers = #tpu.dot_dimension_numbers<[1], [0], [0], [1], [0, 0, 1, 1], [], []>} : vector<16x32xbf16>, vector<32x32xbf16>, vector<16x32xf32> -> vector<16x32xf32>
    %66 = vector.extract_strided_slice %55 {offsets = [1, 0], sizes = [1, 32], strides = [1, 1]} : vector<10x128xf32> to vector<1x32xf32>
    %67 = vector.broadcast %66 : vector<1x32xf32> to vector<16x32xf32>
    %68 = arith.addf %65, %67 : vector<16x32xf32>
    %c0_33 = arith.constant 0 : index
    %c0_34 = arith.constant 0 : index
    %c0_35 = arith.constant 0 : index
    %69 = vector.load %arg9[%c0_33, %c0_34, %c0_35] : memref<2x32x32xbf16, #tpu.memory_space<vmem>>, vector<1x32x32xbf16>
    %70 = vector.shape_cast %69 : vector<1x32x32xbf16> to vector<32x32xbf16>
    %cst_36 = arith.constant dense<0.000000e+00> : vector<16x32xf32>
    %71 = tpu.matmul %56, %70, %cst_36 {dimension_numbers = #tpu.dot_dimension_numbers<[1], [0], [0], [1], [0, 0, 1, 1], [], []>} : vector<16x32xbf16>, vector<32x32xbf16>, vector<16x32xf32> -> vector<16x32xf32>
    %72 = vector.extract_strided_slice %55 {offsets = [2, 0], sizes = [1, 32], strides = [1, 1]} : vector<10x128xf32> to vector<1x32xf32>
    %73 = vector.broadcast %72 : vector<1x32xf32> to vector<16x32xf32>
    %74 = arith.addf %71, %73 : vector<16x32xf32>
    %cst_37 = arith.constant 0.353553385 : f32
    %75 = vector.broadcast %cst_37 : f32 to vector<16x32xf32>
    %76 = arith.mulf %62, %75 : vector<16x32xf32>
    %77 = arith.truncf %76 : vector<16x32xf32> to vector<16x32xbf16>
    %78 = arith.truncf %68 : vector<16x32xf32> to vector<16x32xbf16>
    %79 = arith.truncf %74 : vector<16x32xf32> to vector<16x32xbf16>
    %80 = vector.extract_strided_slice %77 {offsets = [0, 0], sizes = [16, 8], strides = [1, 1]} : vector<16x32xbf16> to vector<16x8xbf16>
    %81 = vector.extract_strided_slice %78 {offsets = [0, 0], sizes = [16, 8], strides = [1, 1]} : vector<16x32xbf16> to vector<16x8xbf16>
    %82 = tpu.transpose %81, [1, 0] : vector<16x8xbf16> -> vector<8x16xbf16>
    %cst_38 = arith.constant dense<0.000000e+00> : vector<16x16xf32>
    %83 = tpu.matmul %80, %82, %cst_38 {dimension_numbers = #tpu.dot_dimension_numbers<[1], [0], [0], [1], [0, 0, 1, 1], [], []>} : vector<16x8xbf16>, vector<8x16xbf16>, vector<16x16xf32> -> vector<16x16xf32>
    %84 = arith.addf %83, %53 : vector<16x16xf32>
    %cst_39 = arith.constant dense<0xFF800000> : vector<16xf32>
    %85 = vector.multi_reduction <maximumf>, %84, %cst_39 [1] : vector<16x16xf32> to vector<16xf32>
    %86 = vector.shape_cast %85 : vector<16xf32> to vector<16x1xf32>
    %87 = vector.broadcast %86 : vector<16x1xf32> to vector<16x16xf32>
    %88 = arith.subf %84, %87 : vector<16x16xf32>
    %89 = math.exp %88 : vector<16x16xf32>
    %cst_40 = arith.constant dense<0.000000e+00> : vector<16xf32>
    %90 = vector.multi_reduction <add>, %89, %cst_40 [1] : vector<16x16xf32> to vector<16xf32>
    %91 = vector.shape_cast %90 : vector<16xf32> to vector<16x1xf32>
    %92 = tpu.reciprocal %91 {approx = true} : vector<16x1xf32> -> vector<16x1xf32>
    %93 = vector.broadcast %92 : vector<16x1xf32> to vector<16x16xf32>
    %94 = arith.mulf %89, %93 : vector<16x16xf32>
    %95 = arith.truncf %94 : vector<16x16xf32> to vector<16x16xbf16>
    %96 = vector.extract_strided_slice %79 {offsets = [0, 0], sizes = [16, 8], strides = [1, 1]} : vector<16x32xbf16> to vector<16x8xbf16>
    %cst_41 = arith.constant dense<0.000000e+00> : vector<16x8xf32>
    %97 = tpu.matmul %95, %96, %cst_41 {dimension_numbers = #tpu.dot_dimension_numbers<[1], [0], [0], [1], [0, 0, 1, 1], [], []>} : vector<16x16xbf16>, vector<16x8xbf16>, vector<16x8xf32> -> vector<16x8xf32>
    %98 = vector.extract_strided_slice %77 {offsets = [0, 8], sizes = [16, 8], strides = [1, 1]} : vector<16x32xbf16> to vector<16x8xbf16>
    %99 = vector.extract_strided_slice %78 {offsets = [0, 8], sizes = [16, 8], strides = [1, 1]} : vector<16x32xbf16> to vector<16x8xbf16>
    %100 = tpu.transpose %99, [1, 0] : vector<16x8xbf16> -> vector<8x16xbf16>
    %cst_42 = arith.constant dense<0.000000e+00> : vector<16x16xf32>
    %101 = tpu.matmul %98, %100, %cst_42 {dimension_numbers = #tpu.dot_dimension_numbers<[1], [0], [0], [1], [0, 0, 1, 1], [], []>} : vector<16x8xbf16>, vector<8x16xbf16>, vector<16x16xf32> -> vector<16x16xf32>
    %102 = arith.addf %101, %53 : vector<16x16xf32>
    %cst_43 = arith.constant dense<0xFF800000> : vector<16xf32>
    %103 = vector.multi_reduction <maximumf>, %102, %cst_43 [1] : vector<16x16xf32> to vector<16xf32>
    %104 = vector.shape_cast %103 : vector<16xf32> to vector<16x1xf32>
    %105 = vector.broadcast %104 : vector<16x1xf32> to vector<16x16xf32>
    %106 = arith.subf %102, %105 : vector<16x16xf32>
    %107 = math.exp %106 : vector<16x16xf32>
    %cst_44 = arith.constant dense<0.000000e+00> : vector<16xf32>
    %108 = vector.multi_reduction <add>, %107, %cst_44 [1] : vector<16x16xf32> to vector<16xf32>
    %109 = vector.shape_cast %108 : vector<16xf32> to vector<16x1xf32>
    %110 = tpu.reciprocal %109 {approx = true} : vector<16x1xf32> -> vector<16x1xf32>
    %111 = vector.broadcast %110 : vector<16x1xf32> to vector<16x16xf32>
    %112 = arith.mulf %107, %111 : vector<16x16xf32>
    %113 = arith.truncf %112 : vector<16x16xf32> to vector<16x16xbf16>
    %114 = vector.extract_strided_slice %79 {offsets = [0, 8], sizes = [16, 8], strides = [1, 1]} : vector<16x32xbf16> to vector<16x8xbf16>
    %cst_45 = arith.constant dense<0.000000e+00> : vector<16x8xf32>
    %115 = tpu.matmul %113, %114, %cst_45 {dimension_numbers = #tpu.dot_dimension_numbers<[1], [0], [0], [1], [0, 0, 1, 1], [], []>} : vector<16x16xbf16>, vector<16x8xbf16>, vector<16x8xf32> -> vector<16x8xf32>
    %116 = vector.extract_strided_slice %77 {offsets = [0, 16], sizes = [16, 8], strides = [1, 1]} : vector<16x32xbf16> to vector<16x8xbf16>
    %117 = vector.extract_strided_slice %78 {offsets = [0, 16], sizes = [16, 8], strides = [1, 1]} : vector<16x32xbf16> to vector<16x8xbf16>
    %118 = tpu.transpose %117, [1, 0] : vector<16x8xbf16> -> vector<8x16xbf16>
    %cst_46 = arith.constant dense<0.000000e+00> : vector<16x16xf32>
    %119 = tpu.matmul %116, %118, %cst_46 {dimension_numbers = #tpu.dot_dimension_numbers<[1], [0], [0], [1], [0, 0, 1, 1], [], []>} : vector<16x8xbf16>, vector<8x16xbf16>, vector<16x16xf32> -> vector<16x16xf32>
    %120 = arith.addf %119, %53 : vector<16x16xf32>
    %cst_47 = arith.constant dense<0xFF800000> : vector<16xf32>
    %121 = vector.multi_reduction <maximumf>, %120, %cst_47 [1] : vector<16x16xf32> to vector<16xf32>
    %122 = vector.shape_cast %121 : vector<16xf32> to vector<16x1xf32>
    %123 = vector.broadcast %122 : vector<16x1xf32> to vector<16x16xf32>
    %124 = arith.subf %120, %123 : vector<16x16xf32>
    %125 = math.exp %124 : vector<16x16xf32>
    %cst_48 = arith.constant dense<0.000000e+00> : vector<16xf32>
    %126 = vector.multi_reduction <add>, %125, %cst_48 [1] : vector<16x16xf32> to vector<16xf32>
    %127 = vector.shape_cast %126 : vector<16xf32> to vector<16x1xf32>
    %128 = tpu.reciprocal %127 {approx = true} : vector<16x1xf32> -> vector<16x1xf32>
    %129 = vector.broadcast %128 : vector<16x1xf32> to vector<16x16xf32>
    %130 = arith.mulf %125, %129 : vector<16x16xf32>
    %131 = arith.truncf %130 : vector<16x16xf32> to vector<16x16xbf16>
    %132 = vector.extract_strided_slice %79 {offsets = [0, 16], sizes = [16, 8], strides = [1, 1]} : vector<16x32xbf16> to vector<16x8xbf16>
    %cst_49 = arith.constant dense<0.000000e+00> : vector<16x8xf32>
    %133 = tpu.matmul %131, %132, %cst_49 {dimension_numbers = #tpu.dot_dimension_numbers<[1], [0], [0], [1], [0, 0, 1, 1], [], []>} : vector<16x16xbf16>, vector<16x8xbf16>, vector<16x8xf32> -> vector<16x8xf32>
    %134 = vector.extract_strided_slice %77 {offsets = [0, 24], sizes = [16, 8], strides = [1, 1]} : vector<16x32xbf16> to vector<16x8xbf16>
    %135 = vector.extract_strided_slice %78 {offsets = [0, 24], sizes = [16, 8], strides = [1, 1]} : vector<16x32xbf16> to vector<16x8xbf16>
    %136 = tpu.transpose %135, [1, 0] : vector<16x8xbf16> -> vector<8x16xbf16>
    %cst_50 = arith.constant dense<0.000000e+00> : vector<16x16xf32>
    %137 = tpu.matmul %134, %136, %cst_50 {dimension_numbers = #tpu.dot_dimension_numbers<[1], [0], [0], [1], [0, 0, 1, 1], [], []>} : vector<16x8xbf16>, vector<8x16xbf16>, vector<16x16xf32> -> vector<16x16xf32>
    %138 = arith.addf %137, %53 : vector<16x16xf32>
    %cst_51 = arith.constant dense<0xFF800000> : vector<16xf32>
    %139 = vector.multi_reduction <maximumf>, %138, %cst_51 [1] : vector<16x16xf32> to vector<16xf32>
    %140 = vector.shape_cast %139 : vector<16xf32> to vector<16x1xf32>
    %141 = vector.broadcast %140 : vector<16x1xf32> to vector<16x16xf32>
    %142 = arith.subf %138, %141 : vector<16x16xf32>
    %143 = math.exp %142 : vector<16x16xf32>
    %cst_52 = arith.constant dense<0.000000e+00> : vector<16xf32>
    %144 = vector.multi_reduction <add>, %143, %cst_52 [1] : vector<16x16xf32> to vector<16xf32>
    %145 = vector.shape_cast %144 : vector<16xf32> to vector<16x1xf32>
    %146 = tpu.reciprocal %145 {approx = true} : vector<16x1xf32> -> vector<16x1xf32>
    %147 = vector.broadcast %146 : vector<16x1xf32> to vector<16x16xf32>
    %148 = arith.mulf %143, %147 : vector<16x16xf32>
    %149 = arith.truncf %148 : vector<16x16xf32> to vector<16x16xbf16>
    %150 = vector.extract_strided_slice %79 {offsets = [0, 24], sizes = [16, 8], strides = [1, 1]} : vector<16x32xbf16> to vector<16x8xbf16>
    %cst_53 = arith.constant dense<0.000000e+00> : vector<16x8xf32>
    %151 = tpu.matmul %149, %150, %cst_53 {dimension_numbers = #tpu.dot_dimension_numbers<[1], [0], [0], [1], [0, 0, 1, 1], [], []>} : vector<16x16xbf16>, vector<16x8xbf16>, vector<16x8xf32> -> vector<16x8xf32>
    %152 = tpu.concatenate %97, %115, %133, %151 in 1 : vector<16x8xf32>, vector<16x8xf32>, vector<16x8xf32>, vector<16x8xf32> -> vector<16x32xf32>
    %153 = arith.truncf %152 : vector<16x32xf32> to vector<16x32xbf16>
    %c0_54 = arith.constant 0 : index
    %c0_55 = arith.constant 0 : index
    %c0_56 = arith.constant 0 : index
    %154 = vector.load %arg10[%c0_54, %c0_55, %c0_56] : memref<2x32x32xbf16, #tpu.memory_space<vmem>>, vector<1x32x32xbf16>
    %155 = vector.shape_cast %154 : vector<1x32x32xbf16> to vector<32x32xbf16>
    %cst_57 = arith.constant dense<0.000000e+00> : vector<16x32xf32>
    %156 = tpu.matmul %153, %155, %cst_57 {dimension_numbers = #tpu.dot_dimension_numbers<[1], [0], [0], [1], [0, 0, 1, 1], [], []>} : vector<16x32xbf16>, vector<32x32xbf16>, vector<16x32xf32> -> vector<16x32xf32>
    %157 = vector.extract_strided_slice %55 {offsets = [3, 0], sizes = [1, 32], strides = [1, 1]} : vector<10x128xf32> to vector<1x32xf32>
    %158 = vector.broadcast %157 : vector<1x32xf32> to vector<16x32xf32>
    %159 = arith.addf %156, %158 : vector<16x32xf32>
    %160 = arith.addf %49, %159 : vector<16x32xf32>
    %161 = vector.extract_strided_slice %55 {offsets = [4, 0], sizes = [1, 32], strides = [1, 1]} : vector<10x128xf32> to vector<1x32xf32>
    %162 = vector.extract_strided_slice %55 {offsets = [5, 0], sizes = [1, 32], strides = [1, 1]} : vector<10x128xf32> to vector<1x32xf32>
    %cst_58 = arith.constant dense<0.000000e+00> : vector<16xf32>
    %163 = vector.multi_reduction <add>, %160, %cst_58 [1] : vector<16x32xf32> to vector<16xf32>
    %164 = vector.shape_cast %163 : vector<16xf32> to vector<16x1xf32>
    %cst_59 = arith.constant 3.200000e+01 : f32
    %165 = vector.broadcast %cst_59 : f32 to vector<16x1xf32>
    %166 = arith.divf %164, %165 : vector<16x1xf32>
    %167 = vector.broadcast %166 : vector<16x1xf32> to vector<16x32xf32>
    %168 = arith.subf %160, %167 : vector<16x32xf32>
    %169 = arith.mulf %168, %168 : vector<16x32xf32>
    %cst_60 = arith.constant dense<0.000000e+00> : vector<16xf32>
    %170 = vector.multi_reduction <add>, %169, %cst_60 [1] : vector<16x32xf32> to vector<16xf32>
    %171 = vector.shape_cast %170 : vector<16xf32> to vector<16x1xf32>
    %cst_61 = arith.constant 3.200000e+01 : f32
    %172 = vector.broadcast %cst_61 : f32 to vector<16x1xf32>
    %173 = arith.divf %171, %172 : vector<16x1xf32>
    %174 = vector.broadcast %166 : vector<16x1xf32> to vector<16x32xf32>
    %175 = arith.subf %160, %174 : vector<16x32xf32>
    %cst_62 = arith.constant 9.99999996E-13 : f32
    %176 = vector.broadcast %cst_62 : f32 to vector<16x1xf32>
    %177 = arith.addf %173, %176 : vector<16x1xf32>
    %178 = math.rsqrt %177 : vector<16x1xf32>
    %179 = vector.broadcast %178 : vector<16x1xf32> to vector<16x32xf32>
    %180 = arith.mulf %175, %179 : vector<16x32xf32>
    %181 = vector.broadcast %161 : vector<1x32xf32> to vector<16x32xf32>
    %182 = arith.mulf %180, %181 : vector<16x32xf32>
    %183 = vector.broadcast %162 : vector<1x32xf32> to vector<16x32xf32>
    %184 = arith.addf %182, %183 : vector<16x32xf32>
    %185 = arith.truncf %184 : vector<16x32xf32> to vector<16x32xbf16>
    %c0_63 = arith.constant 0 : index
    %c0_64 = arith.constant 0 : index
    %c0_65 = arith.constant 0 : index
    %186 = vector.load %arg11[%c0_63, %c0_64, %c0_65] : memref<2x32x64xbf16, #tpu.memory_space<vmem>>, vector<1x32x64xbf16>
    %187 = vector.shape_cast %186 : vector<1x32x64xbf16> to vector<32x64xbf16>
    %cst_66 = arith.constant dense<0.000000e+00> : vector<16x64xf32>
    %188 = tpu.matmul %185, %187, %cst_66 {dimension_numbers = #tpu.dot_dimension_numbers<[1], [0], [0], [1], [0, 0, 1, 1], [], []>} : vector<16x32xbf16>, vector<32x64xbf16>, vector<16x64xf32> -> vector<16x64xf32>
    %189 = vector.extract_strided_slice %55 {offsets = [6, 0], sizes = [1, 64], strides = [1, 1]} : vector<10x128xf32> to vector<1x64xf32>
    %190 = vector.broadcast %189 : vector<1x64xf32> to vector<16x64xf32>
    %191 = arith.addf %188, %190 : vector<16x64xf32>
    %cst_67 = arith.constant 5.000000e-01 : f32
    %192 = vector.broadcast %cst_67 : f32 to vector<16x64xf32>
    %193 = arith.mulf %192, %191 : vector<16x64xf32>
    %cst_68 = arith.constant 4.471500e-02 : f32
    %194 = vector.broadcast %cst_68 : f32 to vector<16x64xf32>
    %195 = arith.mulf %194, %191 : vector<16x64xf32>
    %196 = arith.mulf %195, %191 : vector<16x64xf32>
    %197 = arith.mulf %196, %191 : vector<16x64xf32>
    %198 = arith.addf %191, %197 : vector<16x64xf32>
    %cst_69 = arith.constant 0.797884583 : f32
    %199 = vector.broadcast %cst_69 : f32 to vector<16x64xf32>
    %200 = arith.mulf %199, %198 : vector<16x64xf32>
    %201 = math.tanh %200 : vector<16x64xf32>
    %cst_70 = arith.constant 1.000000e+00 : f32
    %202 = vector.broadcast %cst_70 : f32 to vector<16x64xf32>
    %203 = arith.addf %202, %201 : vector<16x64xf32>
    %204 = arith.mulf %193, %203 : vector<16x64xf32>
    %205 = arith.truncf %204 : vector<16x64xf32> to vector<16x64xbf16>
    %c0_71 = arith.constant 0 : index
    %c0_72 = arith.constant 0 : index
    %c0_73 = arith.constant 0 : index
    %206 = vector.load %arg12[%c0_71, %c0_72, %c0_73] : memref<2x64x32xbf16, #tpu.memory_space<vmem>>, vector<1x64x32xbf16>
    %207 = vector.shape_cast %206 : vector<1x64x32xbf16> to vector<64x32xbf16>
    %cst_74 = arith.constant dense<0.000000e+00> : vector<16x32xf32>
    %208 = tpu.matmul %205, %207, %cst_74 {dimension_numbers = #tpu.dot_dimension_numbers<[1], [0], [0], [1], [0, 0, 1, 1], [], []>} : vector<16x64xbf16>, vector<64x32xbf16>, vector<16x32xf32> -> vector<16x32xf32>
    %209 = vector.extract_strided_slice %55 {offsets = [7, 0], sizes = [1, 32], strides = [1, 1]} : vector<10x128xf32> to vector<1x32xf32>
    %210 = vector.broadcast %209 : vector<1x32xf32> to vector<16x32xf32>
    %211 = arith.addf %208, %210 : vector<16x32xf32>
    %212 = arith.addf %184, %211 : vector<16x32xf32>
    %213 = vector.extract_strided_slice %55 {offsets = [8, 0], sizes = [1, 32], strides = [1, 1]} : vector<10x128xf32> to vector<1x32xf32>
    %214 = vector.extract_strided_slice %55 {offsets = [9, 0], sizes = [1, 32], strides = [1, 1]} : vector<10x128xf32> to vector<1x32xf32>
    %cst_75 = arith.constant dense<0.000000e+00> : vector<16xf32>
    %215 = vector.multi_reduction <add>, %212, %cst_75 [1] : vector<16x32xf32> to vector<16xf32>
    %216 = vector.shape_cast %215 : vector<16xf32> to vector<16x1xf32>
    %cst_76 = arith.constant 3.200000e+01 : f32
    %217 = vector.broadcast %cst_76 : f32 to vector<16x1xf32>
    %218 = arith.divf %216, %217 : vector<16x1xf32>
    %219 = vector.broadcast %218 : vector<16x1xf32> to vector<16x32xf32>
    %220 = arith.subf %212, %219 : vector<16x32xf32>
    %221 = arith.mulf %220, %220 : vector<16x32xf32>
    %cst_77 = arith.constant dense<0.000000e+00> : vector<16xf32>
    %222 = vector.multi_reduction <add>, %221, %cst_77 [1] : vector<16x32xf32> to vector<16xf32>
    %223 = vector.shape_cast %222 : vector<16xf32> to vector<16x1xf32>
    %cst_78 = arith.constant 3.200000e+01 : f32
    %224 = vector.broadcast %cst_78 : f32 to vector<16x1xf32>
    %225 = arith.divf %223, %224 : vector<16x1xf32>
    %226 = vector.broadcast %218 : vector<16x1xf32> to vector<16x32xf32>
    %227 = arith.subf %212, %226 : vector<16x32xf32>
    %cst_79 = arith.constant 9.99999996E-13 : f32
    %228 = vector.broadcast %cst_79 : f32 to vector<16x1xf32>
    %229 = arith.addf %225, %228 : vector<16x1xf32>
    %230 = math.rsqrt %229 : vector<16x1xf32>
    %231 = vector.broadcast %230 : vector<16x1xf32> to vector<16x32xf32>
    %232 = arith.mulf %227, %231 : vector<16x32xf32>
    %233 = vector.broadcast %213 : vector<1x32xf32> to vector<16x32xf32>
    %234 = arith.mulf %232, %233 : vector<16x32xf32>
    %235 = vector.broadcast %214 : vector<1x32xf32> to vector<16x32xf32>
    %236 = arith.addf %234, %235 : vector<16x32xf32>
    %c1 = arith.constant 1 : index
    %c0_80 = arith.constant 0 : index
    %c0_81 = arith.constant 0 : index
    %237 = vector.load %arg17[%c1, %c0_80, %c0_81] : memref<3x16x32xf32, #tpu.memory_space<vmem>>, vector<1x16x32xf32>
    %238 = vector.shape_cast %237 : vector<1x16x32xf32> to vector<16x32xf32>
    %239 = vector.shape_cast %236 : vector<16x32xf32> to vector<1x16x32xf32>
    tpu.vector_store %arg17[%c1, %c0_80, %c0_81], %239 {strides = array<i32>} : memref<3x16x32xf32, #tpu.memory_space<vmem>>, vector<1x16x32xf32>,
    %c1_82 = arith.constant 1 : index
    %c0_83 = arith.constant 0 : index
    %c0_84 = arith.constant 0 : index
    %240 = vector.load %arg13[%c1_82, %c0_83, %c0_84] : memref<2x10x128xf32, #tpu.memory_space<vmem>>, vector<1x10x128xf32>
    %241 = vector.shape_cast %240 : vector<1x10x128xf32> to vector<10x128xf32>
    %242 = arith.truncf %236 : vector<16x32xf32> to vector<16x32xbf16>
    %c1_85 = arith.constant 1 : index
    %c0_86 = arith.constant 0 : index
    %c0_87 = arith.constant 0 : index
    %243 = vector.load %arg7[%c1_85, %c0_86, %c0_87] : memref<2x32x32xbf16, #tpu.memory_space<vmem>>, vector<1x32x32xbf16>
    %244 = vector.shape_cast %243 : vector<1x32x32xbf16> to vector<32x32xbf16>
    %cst_88 = arith.constant dense<0.000000e+00> : vector<16x32xf32>
    %245 = tpu.matmul %242, %244, %cst_88 {dimension_numbers = #tpu.dot_dimension_numbers<[1], [0], [0], [1], [0, 0, 1, 1], [], []>} : vector<16x32xbf16>, vector<32x32xbf16>, vector<16x32xf32> -> vector<16x32xf32>
    %246 = vector.extract_strided_slice %241 {offsets = [0, 0], sizes = [1, 32], strides = [1, 1]} : vector<10x128xf32> to vector<1x32xf32>
    %247 = vector.broadcast %246 : vector<1x32xf32> to vector<16x32xf32>
    %248 = arith.addf %245, %247 : vector<16x32xf32>
    %c1_89 = arith.constant 1 : index
    %c0_90 = arith.constant 0 : index
    %c0_91 = arith.constant 0 : index
    %249 = vector.load %arg8[%c1_89, %c0_90, %c0_91] : memref<2x32x32xbf16, #tpu.memory_space<vmem>>, vector<1x32x32xbf16>
    %250 = vector.shape_cast %249 : vector<1x32x32xbf16> to vector<32x32xbf16>
    %cst_92 = arith.constant dense<0.000000e+00> : vector<16x32xf32>
    %251 = tpu.matmul %242, %250, %cst_92 {dimension_numbers = #tpu.dot_dimension_numbers<[1], [0], [0], [1], [0, 0, 1, 1], [], []>} : vector<16x32xbf16>, vector<32x32xbf16>, vector<16x32xf32> -> vector<16x32xf32>
    %252 = vector.extract_strided_slice %241 {offsets = [1, 0], sizes = [1, 32], strides = [1, 1]} : vector<10x128xf32> to vector<1x32xf32>
    %253 = vector.broadcast %252 : vector<1x32xf32> to vector<16x32xf32>
    %254 = arith.addf %251, %253 : vector<16x32xf32>
    %c1_93 = arith.constant 1 : index
    %c0_94 = arith.constant 0 : index
    %c0_95 = arith.constant 0 : index
    %255 = vector.load %arg9[%c1_93, %c0_94, %c0_95] : memref<2x32x32xbf16, #tpu.memory_space<vmem>>, vector<1x32x32xbf16>
    %256 = vector.shape_cast %255 : vector<1x32x32xbf16> to vector<32x32xbf16>
    %cst_96 = arith.constant dense<0.000000e+00> : vector<16x32xf32>
    %257 = tpu.matmul %242, %256, %cst_96 {dimension_numbers = #tpu.dot_dimension_numbers<[1], [0], [0], [1], [0, 0, 1, 1], [], []>} : vector<16x32xbf16>, vector<32x32xbf16>, vector<16x32xf32> -> vector<16x32xf32>
    %258 = vector.extract_strided_slice %241 {offsets = [2, 0], sizes = [1, 32], strides = [1, 1]} : vector<10x128xf32> to vector<1x32xf32>
    %259 = vector.broadcast %258 : vector<1x32xf32> to vector<16x32xf32>
    %260 = arith.addf %257, %259 : vector<16x32xf32>
    %cst_97 = arith.constant 0.353553385 : f32
    %261 = vector.broadcast %cst_97 : f32 to vector<16x32xf32>
    %262 = arith.mulf %248, %261 : vector<16x32xf32>
    %263 = arith.truncf %262 : vector<16x32xf32> to vector<16x32xbf16>
    %264 = arith.truncf %254 : vector<16x32xf32> to vector<16x32xbf16>
    %265 = arith.truncf %260 : vector<16x32xf32> to vector<16x32xbf16>
    %266 = vector.extract_strided_slice %263 {offsets = [0, 0], sizes = [16, 8], strides = [1, 1]} : vector<16x32xbf16> to vector<16x8xbf16>
    %267 = vector.extract_strided_slice %264 {offsets = [0, 0], sizes = [16, 8], strides = [1, 1]} : vector<16x32xbf16> to vector<16x8xbf16>
    %268 = tpu.transpose %267, [1, 0] : vector<16x8xbf16> -> vector<8x16xbf16>
    %cst_98 = arith.constant dense<0.000000e+00> : vector<16x16xf32>
    %269 = tpu.matmul %266, %268, %cst_98 {dimension_numbers = #tpu.dot_dimension_numbers<[1], [0], [0], [1], [0, 0, 1, 1], [], []>} : vector<16x8xbf16>, vector<8x16xbf16>, vector<16x16xf32> -> vector<16x16xf32>
    %270 = arith.addf %269, %53 : vector<16x16xf32>
    %cst_99 = arith.constant dense<0xFF800000> : vector<16xf32>
    %271 = vector.multi_reduction <maximumf>, %270, %cst_99 [1] : vector<16x16xf32> to vector<16xf32>
    %272 = vector.shape_cast %271 : vector<16xf32> to vector<16x1xf32>
    %273 = vector.broadcast %272 : vector<16x1xf32> to vector<16x16xf32>
    %274 = arith.subf %270, %273 : vector<16x16xf32>
    %275 = math.exp %274 : vector<16x16xf32>
    %cst_100 = arith.constant dense<0.000000e+00> : vector<16xf32>
    %276 = vector.multi_reduction <add>, %275, %cst_100 [1] : vector<16x16xf32> to vector<16xf32>
    %277 = vector.shape_cast %276 : vector<16xf32> to vector<16x1xf32>
    %278 = tpu.reciprocal %277 {approx = true} : vector<16x1xf32> -> vector<16x1xf32>
    %279 = vector.broadcast %278 : vector<16x1xf32> to vector<16x16xf32>
    %280 = arith.mulf %275, %279 : vector<16x16xf32>
    %281 = arith.truncf %280 : vector<16x16xf32> to vector<16x16xbf16>
    %282 = vector.extract_strided_slice %265 {offsets = [0, 0], sizes = [16, 8], strides = [1, 1]} : vector<16x32xbf16> to vector<16x8xbf16>
    %cst_101 = arith.constant dense<0.000000e+00> : vector<16x8xf32>
    %283 = tpu.matmul %281, %282, %cst_101 {dimension_numbers = #tpu.dot_dimension_numbers<[1], [0], [0], [1], [0, 0, 1, 1], [], []>} : vector<16x16xbf16>, vector<16x8xbf16>, vector<16x8xf32> -> vector<16x8xf32>
    %284 = vector.extract_strided_slice %263 {offsets = [0, 8], sizes = [16, 8], strides = [1, 1]} : vector<16x32xbf16> to vector<16x8xbf16>
    %285 = vector.extract_strided_slice %264 {offsets = [0, 8], sizes = [16, 8], strides = [1, 1]} : vector<16x32xbf16> to vector<16x8xbf16>
    %286 = tpu.transpose %285, [1, 0] : vector<16x8xbf16> -> vector<8x16xbf16>
    %cst_102 = arith.constant dense<0.000000e+00> : vector<16x16xf32>
    %287 = tpu.matmul %284, %286, %cst_102 {dimension_numbers = #tpu.dot_dimension_numbers<[1], [0], [0], [1], [0, 0, 1, 1], [], []>} : vector<16x8xbf16>, vector<8x16xbf16>, vector<16x16xf32> -> vector<16x16xf32>
    %288 = arith.addf %287, %53 : vector<16x16xf32>
    %cst_103 = arith.constant dense<0xFF800000> : vector<16xf32>
    %289 = vector.multi_reduction <maximumf>, %288, %cst_103 [1] : vector<16x16xf32> to vector<16xf32>
    %290 = vector.shape_cast %289 : vector<16xf32> to vector<16x1xf32>
    %291 = vector.broadcast %290 : vector<16x1xf32> to vector<16x16xf32>
    %292 = arith.subf %288, %291 : vector<16x16xf32>
    %293 = math.exp %292 : vector<16x16xf32>
    %cst_104 = arith.constant dense<0.000000e+00> : vector<16xf32>
    %294 = vector.multi_reduction <add>, %293, %cst_104 [1] : vector<16x16xf32> to vector<16xf32>
    %295 = vector.shape_cast %294 : vector<16xf32> to vector<16x1xf32>
    %296 = tpu.reciprocal %295 {approx = true} : vector<16x1xf32> -> vector<16x1xf32>
    %297 = vector.broadcast %296 : vector<16x1xf32> to vector<16x16xf32>
    %298 = arith.mulf %293, %297 : vector<16x16xf32>
    %299 = arith.truncf %298 : vector<16x16xf32> to vector<16x16xbf16>
    %300 = vector.extract_strided_slice %265 {offsets = [0, 8], sizes = [16, 8], strides = [1, 1]} : vector<16x32xbf16> to vector<16x8xbf16>
    %cst_105 = arith.constant dense<0.000000e+00> : vector<16x8xf32>
    %301 = tpu.matmul %299, %300, %cst_105 {dimension_numbers = #tpu.dot_dimension_numbers<[1], [0], [0], [1], [0, 0, 1, 1], [], []>} : vector<16x16xbf16>, vector<16x8xbf16>, vector<16x8xf32> -> vector<16x8xf32>
    %302 = vector.extract_strided_slice %263 {offsets = [0, 16], sizes = [16, 8], strides = [1, 1]} : vector<16x32xbf16> to vector<16x8xbf16>
    %303 = vector.extract_strided_slice %264 {offsets = [0, 16], sizes = [16, 8], strides = [1, 1]} : vector<16x32xbf16> to vector<16x8xbf16>
    %304 = tpu.transpose %303, [1, 0] : vector<16x8xbf16> -> vector<8x16xbf16>
    %cst_106 = arith.constant dense<0.000000e+00> : vector<16x16xf32>
    %305 = tpu.matmul %302, %304, %cst_106 {dimension_numbers = #tpu.dot_dimension_numbers<[1], [0], [0], [1], [0, 0, 1, 1], [], []>} : vector<16x8xbf16>, vector<8x16xbf16>, vector<16x16xf32> -> vector<16x16xf32>
    %306 = arith.addf %305, %53 : vector<16x16xf32>
    %cst_107 = arith.constant dense<0xFF800000> : vector<16xf32>
    %307 = vector.multi_reduction <maximumf>, %306, %cst_107 [1] : vector<16x16xf32> to vector<16xf32>
    %308 = vector.shape_cast %307 : vector<16xf32> to vector<16x1xf32>
    %309 = vector.broadcast %308 : vector<16x1xf32> to vector<16x16xf32>
    %310 = arith.subf %306, %309 : vector<16x16xf32>
    %311 = math.exp %310 : vector<16x16xf32>
    %cst_108 = arith.constant dense<0.000000e+00> : vector<16xf32>
    %312 = vector.multi_reduction <add>, %311, %cst_108 [1] : vector<16x16xf32> to vector<16xf32>
    %313 = vector.shape_cast %312 : vector<16xf32> to vector<16x1xf32>
    %314 = tpu.reciprocal %313 {approx = true} : vector<16x1xf32> -> vector<16x1xf32>
    %315 = vector.broadcast %314 : vector<16x1xf32> to vector<16x16xf32>
    %316 = arith.mulf %311, %315 : vector<16x16xf32>
    %317 = arith.truncf %316 : vector<16x16xf32> to vector<16x16xbf16>
    %318 = vector.extract_strided_slice %265 {offsets = [0, 16], sizes = [16, 8], strides = [1, 1]} : vector<16x32xbf16> to vector<16x8xbf16>
    %cst_109 = arith.constant dense<0.000000e+00> : vector<16x8xf32>
    %319 = tpu.matmul %317, %318, %cst_109 {dimension_numbers = #tpu.dot_dimension_numbers<[1], [0], [0], [1], [0, 0, 1, 1], [], []>} : vector<16x16xbf16>, vector<16x8xbf16>, vector<16x8xf32> -> vector<16x8xf32>
    %320 = vector.extract_strided_slice %263 {offsets = [0, 24], sizes = [16, 8], strides = [1, 1]} : vector<16x32xbf16> to vector<16x8xbf16>
    %321 = vector.extract_strided_slice %264 {offsets = [0, 24], sizes = [16, 8], strides = [1, 1]} : vector<16x32xbf16> to vector<16x8xbf16>
    %322 = tpu.transpose %321, [1, 0] : vector<16x8xbf16> -> vector<8x16xbf16>
    %cst_110 = arith.constant dense<0.000000e+00> : vector<16x16xf32>
    %323 = tpu.matmul %320, %322, %cst_110 {dimension_numbers = #tpu.dot_dimension_numbers<[1], [0], [0], [1], [0, 0, 1, 1], [], []>} : vector<16x8xbf16>, vector<8x16xbf16>, vector<16x16xf32> -> vector<16x16xf32>
    %324 = arith.addf %323, %53 : vector<16x16xf32>
    %cst_111 = arith.constant dense<0xFF800000> : vector<16xf32>
    %325 = vector.multi_reduction <maximumf>, %324, %cst_111 [1] : vector<16x16xf32> to vector<16xf32>
    %326 = vector.shape_cast %325 : vector<16xf32> to vector<16x1xf32>
    %327 = vector.broadcast %326 : vector<16x1xf32> to vector<16x16xf32>
    %328 = arith.subf %324, %327 : vector<16x16xf32>
    %329 = math.exp %328 : vector<16x16xf32>
    %cst_112 = arith.constant dense<0.000000e+00> : vector<16xf32>
    %330 = vector.multi_reduction <add>, %329, %cst_112 [1] : vector<16x16xf32> to vector<16xf32>
    %331 = vector.shape_cast %330 : vector<16xf32> to vector<16x1xf32>
    %332 = tpu.reciprocal %331 {approx = true} : vector<16x1xf32> -> vector<16x1xf32>
    %333 = vector.broadcast %332 : vector<16x1xf32> to vector<16x16xf32>
    %334 = arith.mulf %329, %333 : vector<16x16xf32>
    %335 = arith.truncf %334 : vector<16x16xf32> to vector<16x16xbf16>
    %336 = vector.extract_strided_slice %265 {offsets = [0, 24], sizes = [16, 8], strides = [1, 1]} : vector<16x32xbf16> to vector<16x8xbf16>
    %cst_113 = arith.constant dense<0.000000e+00> : vector<16x8xf32>
    %337 = tpu.matmul %335, %336, %cst_113 {dimension_numbers = #tpu.dot_dimension_numbers<[1], [0], [0], [1], [0, 0, 1, 1], [], []>} : vector<16x16xbf16>, vector<16x8xbf16>, vector<16x8xf32> -> vector<16x8xf32>
    %338 = tpu.concatenate %283, %301, %319, %337 in 1 : vector<16x8xf32>, vector<16x8xf32>, vector<16x8xf32>, vector<16x8xf32> -> vector<16x32xf32>
    %339 = arith.truncf %338 : vector<16x32xf32> to vector<16x32xbf16>
    %c1_114 = arith.constant 1 : index
    %c0_115 = arith.constant 0 : index
    %c0_116 = arith.constant 0 : index
    %340 = vector.load %arg10[%c1_114, %c0_115, %c0_116] : memref<2x32x32xbf16, #tpu.memory_space<vmem>>, vector<1x32x32xbf16>
    %341 = vector.shape_cast %340 : vector<1x32x32xbf16> to vector<32x32xbf16>
    %cst_117 = arith.constant dense<0.000000e+00> : vector<16x32xf32>
    %342 = tpu.matmul %339, %341, %cst_117 {dimension_numbers = #tpu.dot_dimension_numbers<[1], [0], [0], [1], [0, 0, 1, 1], [], []>} : vector<16x32xbf16>, vector<32x32xbf16>, vector<16x32xf32> -> vector<16x32xf32>
    %343 = vector.extract_strided_slice %241 {offsets = [3, 0], sizes = [1, 32], strides = [1, 1]} : vector<10x128xf32> to vector<1x32xf32>
    %344 = vector.broadcast %343 : vector<1x32xf32> to vector<16x32xf32>
    %345 = arith.addf %342, %344 : vector<16x32xf32>
    %346 = arith.addf %236, %345 : vector<16x32xf32>
    %347 = vector.extract_strided_slice %241 {offsets = [4, 0], sizes = [1, 32], strides = [1, 1]} : vector<10x128xf32> to vector<1x32xf32>
    %348 = vector.extract_strided_slice %241 {offsets = [5, 0], sizes = [1, 32], strides = [1, 1]} : vector<10x128xf32> to vector<1x32xf32>
    %cst_118 = arith.constant dense<0.000000e+00> : vector<16xf32>
    %349 = vector.multi_reduction <add>, %346, %cst_118 [1] : vector<16x32xf32> to vector<16xf32>
    %350 = vector.shape_cast %349 : vector<16xf32> to vector<16x1xf32>
    %cst_119 = arith.constant 3.200000e+01 : f32
    %351 = vector.broadcast %cst_119 : f32 to vector<16x1xf32>
    %352 = arith.divf %350, %351 : vector<16x1xf32>
    %353 = vector.broadcast %352 : vector<16x1xf32> to vector<16x32xf32>
    %354 = arith.subf %346, %353 : vector<16x32xf32>
    %355 = arith.mulf %354, %354 : vector<16x32xf32>
    %cst_120 = arith.constant dense<0.000000e+00> : vector<16xf32>
    %356 = vector.multi_reduction <add>, %355, %cst_120 [1] : vector<16x32xf32> to vector<16xf32>
    %357 = vector.shape_cast %356 : vector<16xf32> to vector<16x1xf32>
    %cst_121 = arith.constant 3.200000e+01 : f32
    %358 = vector.broadcast %cst_121 : f32 to vector<16x1xf32>
    %359 = arith.divf %357, %358 : vector<16x1xf32>
    %360 = vector.broadcast %352 : vector<16x1xf32> to vector<16x32xf32>
    %361 = arith.subf %346, %360 : vector<16x32xf32>
    %cst_122 = arith.constant 9.99999996E-13 : f32
    %362 = vector.broadcast %cst_122 : f32 to vector<16x1xf32>
    %363 = arith.addf %359, %362 : vector<16x1xf32>
    %364 = math.rsqrt %363 : vector<16x1xf32>
    %365 = vector.broadcast %364 : vector<16x1xf32> to vector<16x32xf32>
    %366 = arith.mulf %361, %365 : vector<16x32xf32>
    %367 = vector.broadcast %347 : vector<1x32xf32> to vector<16x32xf32>
    %368 = arith.mulf %366, %367 : vector<16x32xf32>
    %369 = vector.broadcast %348 : vector<1x32xf32> to vector<16x32xf32>
    %370 = arith.addf %368, %369 : vector<16x32xf32>
    %371 = arith.truncf %370 : vector<16x32xf32> to vector<16x32xbf16>
    %c1_123 = arith.constant 1 : index
    %c0_124 = arith.constant 0 : index
    %c0_125 = arith.constant 0 : index
    %372 = vector.load %arg11[%c1_123, %c0_124, %c0_125] : memref<2x32x64xbf16, #tpu.memory_space<vmem>>, vector<1x32x64xbf16>
    %373 = vector.shape_cast %372 : vector<1x32x64xbf16> to vector<32x64xbf16>
    %cst_126 = arith.constant dense<0.000000e+00> : vector<16x64xf32>
    %374 = tpu.matmul %371, %373, %cst_126 {dimension_numbers = #tpu.dot_dimension_numbers<[1], [0], [0], [1], [0, 0, 1, 1], [], []>} : vector<16x32xbf16>, vector<32x64xbf16>, vector<16x64xf32> -> vector<16x64xf32>
    %375 = vector.extract_strided_slice %241 {offsets = [6, 0], sizes = [1, 64], strides = [1, 1]} : vector<10x128xf32> to vector<1x64xf32>
    %376 = vector.broadcast %375 : vector<1x64xf32> to vector<16x64xf32>
    %377 = arith.addf %374, %376 : vector<16x64xf32>
    %cst_127 = arith.constant 5.000000e-01 : f32
    %378 = vector.broadcast %cst_127 : f32 to vector<16x64xf32>
    %379 = arith.mulf %378, %377 : vector<16x64xf32>
    %cst_128 = arith.constant 4.471500e-02 : f32
    %380 = vector.broadcast %cst_128 : f32 to vector<16x64xf32>
    %381 = arith.mulf %380, %377 : vector<16x64xf32>
    %382 = arith.mulf %381, %377 : vector<16x64xf32>
    %383 = arith.mulf %382, %377 : vector<16x64xf32>
    %384 = arith.addf %377, %383 : vector<16x64xf32>
    %cst_129 = arith.constant 0.797884583 : f32
    %385 = vector.broadcast %cst_129 : f32 to vector<16x64xf32>
    %386 = arith.mulf %385, %384 : vector<16x64xf32>
    %387 = math.tanh %386 : vector<16x64xf32>
    %cst_130 = arith.constant 1.000000e+00 : f32
    %388 = vector.broadcast %cst_130 : f32 to vector<16x64xf32>
    %389 = arith.addf %388, %387 : vector<16x64xf32>
    %390 = arith.mulf %379, %389 : vector<16x64xf32>
    %391 = arith.truncf %390 : vector<16x64xf32> to vector<16x64xbf16>
    %c1_131 = arith.constant 1 : index
    %c0_132 = arith.constant 0 : index
    %c0_133 = arith.constant 0 : index
    %392 = vector.load %arg12[%c1_131, %c0_132, %c0_133] : memref<2x64x32xbf16, #tpu.memory_space<vmem>>, vector<1x64x32xbf16>
    %393 = vector.shape_cast %392 : vector<1x64x32xbf16> to vector<64x32xbf16>
    %cst_134 = arith.constant dense<0.000000e+00> : vector<16x32xf32>
    %394 = tpu.matmul %391, %393, %cst_134 {dimension_numbers = #tpu.dot_dimension_numbers<[1], [0], [0], [1], [0, 0, 1, 1], [], []>} : vector<16x64xbf16>, vector<64x32xbf16>, vector<16x32xf32> -> vector<16x32xf32>
    %395 = vector.extract_strided_slice %241 {offsets = [7, 0], sizes = [1, 32], strides = [1, 1]} : vector<10x128xf32> to vector<1x32xf32>
    %396 = vector.broadcast %395 : vector<1x32xf32> to vector<16x32xf32>
    %397 = arith.addf %394, %396 : vector<16x32xf32>
    %398 = arith.addf %370, %397 : vector<16x32xf32>
    %399 = vector.extract_strided_slice %241 {offsets = [8, 0], sizes = [1, 32], strides = [1, 1]} : vector<10x128xf32> to vector<1x32xf32>
    %400 = vector.extract_strided_slice %241 {offsets = [9, 0], sizes = [1, 32], strides = [1, 1]} : vector<10x128xf32> to vector<1x32xf32>
    %cst_135 = arith.constant dense<0.000000e+00> : vector<16xf32>
    %401 = vector.multi_reduction <add>, %398, %cst_135 [1] : vector<16x32xf32> to vector<16xf32>
    %402 = vector.shape_cast %401 : vector<16xf32> to vector<16x1xf32>
    %cst_136 = arith.constant 3.200000e+01 : f32
    %403 = vector.broadcast %cst_136 : f32 to vector<16x1xf32>
    %404 = arith.divf %402, %403 : vector<16x1xf32>
    %405 = vector.broadcast %404 : vector<16x1xf32> to vector<16x32xf32>
    %406 = arith.subf %398, %405 : vector<16x32xf32>
    %407 = arith.mulf %406, %406 : vector<16x32xf32>
    %cst_137 = arith.constant dense<0.000000e+00> : vector<16xf32>
    %408 = vector.multi_reduction <add>, %407, %cst_137 [1] : vector<16x32xf32> to vector<16xf32>
    %409 = vector.shape_cast %408 : vector<16xf32> to vector<16x1xf32>
    %cst_138 = arith.constant 3.200000e+01 : f32
    %410 = vector.broadcast %cst_138 : f32 to vector<16x1xf32>
    %411 = arith.divf %409, %410 : vector<16x1xf32>
    %412 = vector.broadcast %404 : vector<16x1xf32> to vector<16x32xf32>
    %413 = arith.subf %398, %412 : vector<16x32xf32>
    %cst_139 = arith.constant 9.99999996E-13 : f32
    %414 = vector.broadcast %cst_139 : f32 to vector<16x1xf32>
    %415 = arith.addf %411, %414 : vector<16x1xf32>
    %416 = math.rsqrt %415 : vector<16x1xf32>
    %417 = vector.broadcast %416 : vector<16x1xf32> to vector<16x32xf32>
    %418 = arith.mulf %413, %417 : vector<16x32xf32>
    %419 = vector.broadcast %399 : vector<1x32xf32> to vector<16x32xf32>
    %420 = arith.mulf %418, %419 : vector<16x32xf32>
    %421 = vector.broadcast %400 : vector<1x32xf32> to vector<16x32xf32>
    %422 = arith.addf %420, %421 : vector<16x32xf32>
    %c2 = arith.constant 2 : index
    %c0_140 = arith.constant 0 : index
    %c0_141 = arith.constant 0 : index
    %423 = vector.load %arg17[%c2, %c0_140, %c0_141] : memref<3x16x32xf32, #tpu.memory_space<vmem>>, vector<1x16x32xf32>
    %424 = vector.shape_cast %423 : vector<1x16x32xf32> to vector<16x32xf32>
    %425 = vector.shape_cast %422 : vector<16x32xf32> to vector<1x16x32xf32>
    tpu.vector_store %arg17[%c2, %c0_140, %c0_141], %425 {strides = array<i32>} : memref<3x16x32xf32, #tpu.memory_space<vmem>>, vector<1x16x32xf32>,
    %426 = arith.truncf %422 : vector<16x32xf32> to vector<16x32xbf16>
    %427 = vector.extract_strided_slice %422 {offsets = [0, 0], sizes = [1, 32], strides = [1, 1]} : vector<16x32xf32> to vector<1x32xf32>
    %428 = vector.extract_strided_slice %422 {offsets = [8, 0], sizes = [1, 32], strides = [1, 1]} : vector<16x32xf32> to vector<1x32xf32>
    %429 = tpu.concatenate %427, %428 in 0 : vector<1x32xf32>, vector<1x32xf32> -> vector<2x32xf32>
    %430 = arith.truncf %429 : vector<2x32xf32> to vector<2x32xbf16>
    %c0_142 = arith.constant 0 : index
    %c0_143 = arith.constant 0 : index
    %431 = vector.load %arg14[%c0_142, %c0_143] : memref<32x32xbf16, #tpu.memory_space<vmem>>, vector<32x32xbf16>
    %cst_144 = arith.constant dense<0.000000e+00> : vector<2x32xf32>
    %432 = tpu.matmul %430, %431, %cst_144 {dimension_numbers = #tpu.dot_dimension_numbers<[1], [0], [0], [1], [0, 0, 1, 1], [], []>} : vector<2x32xbf16>, vector<32x32xbf16>, vector<2x32xf32> -> vector<2x32xf32>
    %433 = vector.extract_strided_slice %0 {offsets = [4, 0], sizes = [1, 32], strides = [1, 1]} : vector<10x128xf32> to vector<1x32xf32>
    %434 = vector.broadcast %433 : vector<1x32xf32> to vector<2x32xf32>
    %435 = arith.addf %432, %434 : vector<2x32xf32>
    %436 = math.tanh %435 : vector<2x32xf32>
    %437 = arith.truncf %436 : vector<2x32xf32> to vector<2x32xbf16>
    %c0_145 = arith.constant 0 : index
    %c0_146 = arith.constant 0 : index
    %438 = vector.load %arg15[%c0_145, %c0_146] : memref<32x128xbf16, #tpu.memory_space<vmem>>, vector<32x128xbf16>
    %cst_147 = arith.constant dense<0.000000e+00> : vector<2x128xf32>
    %439 = tpu.matmul %437, %438, %cst_147 {dimension_numbers = #tpu.dot_dimension_numbers<[1], [0], [0], [1], [0, 0, 1, 1], [], []>} : vector<2x32xbf16>, vector<32x128xbf16>, vector<2x128xf32> -> vector<2x128xf32>
    %440 = vector.extract_strided_slice %0 {offsets = [8, 0], sizes = [1, 128], strides = [1, 1]} : vector<10x128xf32> to vector<1x128xf32>
    %441 = vector.broadcast %440 : vector<1x128xf32> to vector<2x128xf32>
    %442 = arith.addf %439, %441 : vector<2x128xf32>
    %c0_148 = arith.constant 0 : index
    %c0_149 = arith.constant 0 : index
    %443 = vector.load %arg19[%c0_148, %c0_149] : memref<2x128xf32, #tpu.memory_space<vmem>>, vector<2x128xf32>
    tpu.vector_store %arg19[%c0_148, %c0_149], %442 {strides = array<i32>} : memref<2x128xf32, #tpu.memory_space<vmem>>, vector<2x128xf32>,
    %c0_150 = arith.constant 0 : index
    %c0_151 = arith.constant 0 : index
    %444 = vector.load %arg16[%c0_150, %c0_151] : memref<32x32xbf16, #tpu.memory_space<vmem>>, vector<32x32xbf16>
    %cst_152 = arith.constant dense<0.000000e+00> : vector<16x32xf32>
    %445 = tpu.matmul %426, %444, %cst_152 {dimension_numbers = #tpu.dot_dimension_numbers<[1], [0], [0], [1], [0, 0, 1, 1], [], []>} : vector<16x32xbf16>, vector<32x32xbf16>, vector<16x32xf32> -> vector<16x32xf32>
    %446 = vector.extract_strided_slice %0 {offsets = [5, 0], sizes = [1, 32], strides = [1, 1]} : vector<10x128xf32> to vector<1x32xf32>
    %447 = vector.broadcast %446 : vector<1x32xf32> to vector<16x32xf32>
    %448 = arith.addf %445, %447 : vector<16x32xf32>
    %cst_153 = arith.constant 5.000000e-01 : f32
    %449 = vector.broadcast %cst_153 : f32 to vector<16x32xf32>
    %450 = arith.mulf %449, %448 : vector<16x32xf32>
    %cst_154 = arith.constant 4.471500e-02 : f32
    %451 = vector.broadcast %cst_154 : f32 to vector<16x32xf32>
    %452 = arith.mulf %451, %448 : vector<16x32xf32>
    %453 = arith.mulf %452, %448 : vector<16x32xf32>
    %454 = arith.mulf %453, %448 : vector<16x32xf32>
    %455 = arith.addf %448, %454 : vector<16x32xf32>
    %cst_155 = arith.constant 0.797884583 : f32
    %456 = vector.broadcast %cst_155 : f32 to vector<16x32xf32>
    %457 = arith.mulf %456, %455 : vector<16x32xf32>
    %458 = math.tanh %457 : vector<16x32xf32>
    %cst_156 = arith.constant 1.000000e+00 : f32
    %459 = vector.broadcast %cst_156 : f32 to vector<16x32xf32>
    %460 = arith.addf %459, %458 : vector<16x32xf32>
    %461 = arith.mulf %450, %460 : vector<16x32xf32>
    %462 = vector.extract_strided_slice %0 {offsets = [6, 0], sizes = [1, 32], strides = [1, 1]} : vector<10x128xf32> to vector<1x32xf32>
    %463 = vector.extract_strided_slice %0 {offsets = [7, 0], sizes = [1, 32], strides = [1, 1]} : vector<10x128xf32> to vector<1x32xf32>
    %cst_157 = arith.constant dense<0.000000e+00> : vector<16xf32>
    %464 = vector.multi_reduction <add>, %461, %cst_157 [1] : vector<16x32xf32> to vector<16xf32>
    %465 = vector.shape_cast %464 : vector<16xf32> to vector<16x1xf32>
    %cst_158 = arith.constant 3.200000e+01 : f32
    %466 = vector.broadcast %cst_158 : f32 to vector<16x1xf32>
    %467 = arith.divf %465, %466 : vector<16x1xf32>
    %468 = vector.broadcast %467 : vector<16x1xf32> to vector<16x32xf32>
    %469 = arith.subf %461, %468 : vector<16x32xf32>
    %470 = arith.mulf %469, %469 : vector<16x32xf32>
    %cst_159 = arith.constant dense<0.000000e+00> : vector<16xf32>
    %471 = vector.multi_reduction <add>, %470, %cst_159 [1] : vector<16x32xf32> to vector<16xf32>
    %472 = vector.shape_cast %471 : vector<16xf32> to vector<16x1xf32>
    %cst_160 = arith.constant 3.200000e+01 : f32
    %473 = vector.broadcast %cst_160 : f32 to vector<16x1xf32>
    %474 = arith.divf %472, %473 : vector<16x1xf32>
    %475 = vector.broadcast %467 : vector<16x1xf32> to vector<16x32xf32>
    %476 = arith.subf %461, %475 : vector<16x32xf32>
    %cst_161 = arith.constant 9.99999996E-13 : f32
    %477 = vector.broadcast %cst_161 : f32 to vector<16x1xf32>
    %478 = arith.addf %474, %477 : vector<16x1xf32>
    %479 = math.rsqrt %478 : vector<16x1xf32>
    %480 = vector.broadcast %479 : vector<16x1xf32> to vector<16x32xf32>
    %481 = arith.mulf %476, %480 : vector<16x32xf32>
    %482 = vector.broadcast %462 : vector<1x32xf32> to vector<16x32xf32>
    %483 = arith.mulf %481, %482 : vector<16x32xf32>
    %484 = vector.broadcast %463 : vector<1x32xf32> to vector<16x32xf32>
    %485 = arith.addf %483, %484 : vector<16x32xf32>
    %486 = arith.truncf %485 : vector<16x32xf32> to vector<16x32xbf16>
    %c0_162 = arith.constant 0 : index
    %c0_163 = arith.constant 0 : index
    %487 = vector.load %arg5[%c0_162, %c0_163] : memref<32x128xbf16, #tpu.memory_space<vmem>>, vector<32x128xbf16>
    %cst_164 = arith.constant dense<0.000000e+00> : vector<16x128xf32>
    %488 = tpu.matmul %486, %487, %cst_164 {dimension_numbers = #tpu.dot_dimension_numbers<[1], [0], [0], [1], [0, 0, 1, 1], [], []>} : vector<16x32xbf16>, vector<32x128xbf16>, vector<16x128xf32> -> vector<16x128xf32>
    %489 = vector.extract_strided_slice %0 {offsets = [9, 0], sizes = [1, 128], strides = [1, 1]} : vector<10x128xf32> to vector<1x128xf32>
    %490 = vector.broadcast %489 : vector<1x128xf32> to vector<16x128xf32>
    %491 = arith.addf %488, %490 : vector<16x128xf32>
    %c0_165 = arith.constant 0 : index
    %c0_166 = arith.constant 0 : index
    %492 = vector.load %arg18[%c0_165, %c0_166] : memref<16x128xf32, #tpu.memory_space<vmem>>, vector<16x128xf32>
    tpu.vector_store %arg18[%c0_165, %c0_166], %491 {strides = array<i32>} : memref<16x128xf32, #tpu.memory_space<vmem>>, vector<16x128xf32>,
    return
  }
}

</mosaic_0001>

<bundles_post_ra>
// kernel: eq.8
= control target key start
LH: loop header
LB: loop body
LE: loop exit
PB: predicated region body
PF: predicated region fallthrough
CT: control target
= control target key end

     0   :  { %vm7_vm0 = vcmask 64512   ;;  %vm13_vm1 = vcmask 130112   ;;  %s39_s0 = inlined_call_operand.vmem [shape: s32[2,8], index: 0, kind: input, shape index: {}]   ;;  %s40_s1 = inlined_call_operand.vmem [shape: s32[16], index: 1, kind: output, shape index: {}]  }
   0x1   :  { %v4_v0 = vld [vmem:[%s39_s0] sm:$0x3]  ;;  %s22_s0 = smov 8  }
   0x2   :  { %5 = vst [vmem:[#allocation1] sm:$0x3] %v4_v0 }
   0x9   :  { %v10_v1 = vld [vmem:[#allocation1 + $0x1] sm:$0x1]   ;;  %v6_v2 = vld [vmem:[#allocation1] sm:$0x1]  }
   0xa   :  { %11 = vrot.lane.b32.xlu0 %v10_v1, %s22_s0  ;;  %8 = vst.msk [vmem:[#allocation0] sm:$0x1] %vm7_vm0, %v6_v2  }
  0x7c   :  { %v12_v3 = vpop.permute.xlu0 %11  }
  0x7d   :  { %14 = vst.msk [vmem:[#allocation0] sm:$0x1] %vm13_vm1, %v12_v3  }
  0x84   :  { %v18_v4 = vld [vmem:[#allocation0] sm:$0x1] }
  0x85   :  { %20 = vst [vmem:[%s40_s1] sm:$0x1] %v18_v4 }

// kernel: encode.1
= control target key start
LH: loop header
LB: loop body
LE: loop exit
PB: predicated region body
PF: predicated region fallthrough
CT: control target
= control target key end

     0   :  { %s4149_s0 = inlined_call_operand.vmem [shape: s32[16,1], index: 0, kind: input, shape index: {}]   ;;  %s4150_s1 = inlined_call_operand.vmem [shape: f32[16,1], index: 1, kind: input, shape index: {}]   ;;  %s4151_s2 = inlined_call_operand.vmem [shape: f32[16,16], index: 2, kind: input, shape index: {}]   ;;  %s4152_s3 = inlined_call_operand.vmem [shape: f32[16,32], index: 3, kind: input, shape index: {}]   ;;  %s4153_s4 = inlined_call_operand.vmem [shape: bf16[128,32], index: 4, kind: input, shape index: {}]   ;;  %s4154_s5 = inlined_call_operand.vmem [shape: bf16[32,128], index: 5, kind: input, shape index: {}]   ;;  %s4155_s6 = inlined_call_operand.vmem [shape: f32[10,128], index: 6, kind: input, shape index: {}]   ;;  %s4156_s7 = inlined_call_operand.vmem [shape: bf16[2,32,32], index: 7, kind: input, shape index: {}]   ;;  %s4157_s8 = inlined_call_operand.vmem [shape: bf16[2,32,32], index: 8, kind: input, shape index: {}]   ;;  %s4158_s9 = inlined_call_operand.vmem [shape: bf16[2,32,32], index: 9, kind: input, shape index: {}]   ;;  %s4159_s10 = inlined_call_operand.vmem [shape: bf16[2,32,32], index: 10, kind: input, shape index: {}]   ;;  %s4160_s11 = inlined_call_operand.vmem [shape: bf16[2,32,64], index: 11, kind: input, shape index: {}]   ;;  %s4161_s12 = inlined_call_operand.vmem [shape: bf16[2,64,32], index: 12, kind: input, shape index: {}]   ;;  %s4162_s13 = inlined_call_operand.vmem [shape: f32[2,10,128], index: 13, kind: input, shape index: {}]   ;;  %s4163_s14 = inlined_call_operand.vmem [shape: bf16[32,32], index: 14, kind: input, shape index: {}]   ;;  %s4164_s15 = inlined_call_operand.vmem [shape: bf16[32,128], index: 15, kind: input, shape index: {}]   ;;  %s4165_s16 = inlined_call_operand.hbm [shape: bf16[32,32], index: 16, kind: input, shape index: {}]   ;;  %s4166_s17 = inlined_call_operand.vmem [shape: f32[3,16,32], index: 17, kind: output, shape index: {0}]   ;;  %s4167_s18 = inlined_call_operand.hbm [shape: f32[16,128], index: 18, kind: output, shape index: {1}]   ;;  %s4168_s19 = inlined_call_operand.hbm [shape: f32[2,128], index: 19, kind: output, shape index: {2}]  }
   0x1   :  { %4173 = sst [smem:[#allocation11_spill]] %s4149_s0 }
   0x2   :  { %4174 = sst [smem:[#allocation12_spill]] %s4150_s1 }
   0x3   :  { %4175 = sst [smem:[#allocation13_spill]] %s4151_s2 }
   0x4   :  { %4176 = sst [smem:[#allocation14_spill]] %s4152_s3 }
   0x5   :  { %25 = vsyncpa [#allocation3], 0 }
   0x6   :  { %26 = vsyncpa [#allocation4], 0 }
   0x7   :  { %27 = vsyncpa [#allocation7], 0  ;;  %s3409_s0 = smov [#allocation2]   ;;  %s3337_s1 = scalar_lea.hbm %s4165_s16, 256 }
   0x8   :  { %s65_s30 = sshll.u32 %s3409_s0, 4  ;;  %p3338_p0 = scmp.ne.s32.totalorder %s4165_s16, %s3337_s1  ;;  %s66_s30 = int_to_ptr.vmem [resolvable:$true] %s65_s30 }
   0x9   :  { %p3341_p1 = scmp.lt.u32.totalorder %s3337_s1, %s4165_s16 }
   0xb   :  { %p3343_p2 = pnand %p3341_p1, %p3338_p0 }
   0xd   :  { %3346 = shalt.err (!%p3343_p2)
}
   0xe   :  { %s3347_s25 = scalar_lea.vmem %s66_s30, 256  ;;  %p3352_p4 = scmp.lt.s32.totalorder %s66_s30, %s66_s30 }
   0xf   :  { %p3348_p3 = scmp.ne.s32.totalorder %s66_s30, %s3347_s25  ;;  %p3353_p5 = scmp.lt.s32.totalorder %s3347_s25, %s3347_s25 }
  0x11   :  { %p3354_p6 = por %p3353_p5, %p3352_p4 }
  0x13   :  { %p3355_p7 = pnand %p3354_p6, %p3348_p3 }
  0x15   :  { %3358 = shalt.err (!%p3355_p7)
}
  0x16   :  { %s3410_s3 = smov 64   ;;  %s3411_s26 = smov 4  }
  0x17   :  { %71 = dma.hbm_to_vmem [thread:$0]  %s4165_s16, 256, %s66_s30, [#allocation3], %s3410_s3, %s3410_s3, %s3411_s26  }
  0x18   :  { %3403 = dma.done.wait [#allocation3], 256  }
  0x19   :  { %3404 = vsyncadd [#allocation3], 4294967040  ;;  %v3412_v0 = vmov 0   ;;  %v3413_v1 = vmov 0.0   ;;  %s4177_s20 = sld [smem:[#allocation11_spill]]  ;;  %v3190_v3 = vld [vmem:[%s4153_s4] sm:$0xff]   ;;  %v80_v16 = vlaneseq }
  0x1a   :  { %3158 = vset.pattern.permute.xlu0 %v3412_v0  ;;  %2890 = vmatprep.subr.bf16.mxu0 %v3413_v1  ;;  %v3191_v5 = vld [vmem:[%s4153_s4 + $0x8] sm:$0xff]   ;;  %s4178_s25 = sld [smem:[#allocation12_spill]]  ;;  %vm3414_vm0 = vmmov 0   ;;  %v3192_v7 = vld [vmem:[%s4153_s4 + $0x10] sm:$0xff]   ;;  %v3193_v10 = vld [vmem:[%s4153_s4 + $0x18] sm:$0xff]   ;;  %s4179_s26 = sld [smem:[#allocation14_spill]] }
  0x1b   :  { %3159 = vset.pattern.permute.xlu1 %v3412_v0  ;;  %2910 = vmatprep.subr.bf16.mxu1 %v3413_v1  ;;  %v3194_v12 = vld [vmem:[%s4153_s4 + $0x20] sm:$0xff]   ;;  %v3195_v13 = vld [vmem:[%s4153_s4 + $0x28] sm:$0xff]   ;;  %v3196_v14 = vld [vmem:[%s4153_s4 + $0x30] sm:$0xff]   ;;  %v81_v18 = vand.u32 127, %v80_v16  ;;  %v3415_v20 = vmov 1.0|1.0  }
  0x1c   :  { %2891 = vmatpush3.bf16.msra.mxu0 %v3190_v3  ;;  %2906 = vmatprep.mubr.msk.bf16.mxu0 %vm3414_vm0, %v3413_v1  ;;  %v3197_v15 = vld [vmem:[%s4153_s4 + $0x38] sm:$0xff]   ;;  %v3589_v22 = vshrl.u32 %v80_v16, 7  ;;  %v76_v25 = vld [vmem:[%s4155_s6] sm:$0xff]  ;;  %vm240_vm4 = vcmask 261120   ;;  %v3199_v60 = vld [vmem:[%s4156_s7 + $0x8] sm:$0xff]   ;;  %s3416_s0 = smov 120  }
  0x1d   :  { %2892 = vmatprep.subr.bf16.mxu0 %v3413_v1  ;;  %2914 = vmatprep.mubr.msk.bf16.mxu1 %vm3414_vm0, %v3413_v1  ;;  %v3198_v59 = vld [vmem:[%s4156_s7] sm:$0xff]   ;;  %vm478_vm5 = vcmask 64512   ;;  %s3418_s21 = smov 112   ;;  %s4180_s30 = sld [smem:[#allocation13_spill]]  ;;  %vm526_vm6 = vcmask 130048   ;;  %vm988_vm7 = vcmask 195584  }
  0x1e   :  { %v3592_v23 = vsub.s32 2, %v3589_v22  ;;  %v3595_v24 = vsub.s32 3, %v3589_v22  ;;  %2911 = vmatpush3.bf16.msra.mxu1 %v3198_v59  ;;  %v3200_v16 = vld [vmem:[%s4157_s8] sm:$0xff]   ;;  %s3419_s24 = smov 8   ;;  %s3421_s27 = smov 24   ;;  %vm1216_vm8 = vcmask 523264  }
  0x1f   :  { %v78_v2 = vld [vmem:[%s4177_s20] sm:$0xff]  ;;  %v79_v4 = vld [vmem:[%s4177_s20 + $0x8] sm:$0xff]  ;;  %2912 = vmatprep.subr.bf16.mxu1 %v3413_v1  ;;  %s3417_s20 = smov 104   ;;  %vm2331_vm9 = vcmask 1040384  }
  0x20   :  { %83 = vperm.xlu0 %3158, %v78_v2   ;;  %v109_v6 = vld [vmem:[%s4178_s25] sm:$0xff]  ;;  %2893 = vmatpush3.bf16.msra.mxu0 %v3191_v5  ;;  %v110_v9 = vld [vmem:[%s4178_s25 + $0x8] sm:$0xff]  ;;  %v207_v27 = vrot.slane %v76_v25, %v3592_v23  ;;  %v225_v29 = vrot.slane %v76_v25, %v3595_v24  ;;  %v3624_v5 = vsub.s32 1, %v3589_v22 }
  0x21   :  { %2894 = vmatprep.subr.bf16.mxu0 %v3413_v1  ;;  %v202_v8 = vsub.f32 1.0, %v109_v6  ;;  %v203_v11 = vsub.f32 1.0, %v110_v9  ;;  %v111_v28 = vld [vmem:[%s4179_s26] sm:$0xff]  ;;  %v112_v32 = vld [vmem:[%s4179_s26 + $0x8] sm:$0xff]  ;;  %s3420_s26 = smov 16  }
  0x22   :  { %2913 = vmatpush3.bf16.msra.mxu1 %v3199_v60 }
  0x23   :  { %210 = vperm.xlu1 %3159, %v202_v8   ;;  %2918 = vmatprep.subr.bf16.mxu1 %v3413_v1 }
  0x24   :  { %86 = vperm.xlu0 %3158, %v79_v4   ;;  %2895 = vmatpush3.bf16.msra.mxu0 %v3192_v7  ;;  %v3621_v4 = vsub.s32 0, %v3589_v22 }
  0x25   :  { %2896 = vmatprep.subr.bf16.mxu0 %v3413_v1 }
  0x27   :  { %215 = vperm.xlu1 %3159, %v203_v11  }
  0x28   :  { %228 = vperm.xlu0 %3158, %v109_v6   ;;  %2897 = vmatpush3.bf16.msra.mxu0 %v3193_v10  ;;  %v271_v6 = vrot.slane %v76_v25, %v3621_v4 }
  0x29   :  { %2898 = vmatprep.subr.bf16.mxu0 %v3413_v1 }
  0x2b   :  { %233 = vperm.xlu1 %3159, %v110_v9   ;;  %v277_v9 = vrot.slane %v76_v25, %v3624_v5 }
  0x2c   :  { %2899 = vmatpush3.bf16.msra.mxu0 %v3194_v12 }
  0x2d   :  { %2900 = vmatprep.subr.bf16.mxu0 %v3413_v1 }
  0x30   :  { %2901 = vmatpush3.bf16.msra.mxu0 %v3195_v13 }
  0x31   :  { %2902 = vmatprep.subr.bf16.mxu0 %v3413_v1 }
  0x34   :  { %2903 = vmatpush3.bf16.msra.mxu0 %v3196_v14 }
  0x35   :  { %2904 = vmatprep.subr.bf16.mxu0 %v3413_v1 }
  0x38   :  { %2905 = vmatpush3.bf16.msra.mxu0 %v3197_v15 }
  0x39   :  { %2940 = vmatprep.subr.bf16.mxu0 %v3413_v1 }
  0x9f   :  { %v84_v17 = vpop.permute.xlu0 %83 }
  0xa0   :  { %vm88_vm1 = vcmp.eq.s32.totalorder %v84_v17, %v81_v18 }
  0xa2   :  { %v211_v21 = vpop.permute.xlu1 %210 }
  0xa3   :  { %v87_v19 = vpop.permute.xlu0 %86  ;;  %v218_v33 = vmul.f32 %v211_v21, %v207_v27  ;;  %v3672_v21 = vld [vmem:[%s4162_s13] sm:$0xff] }
  0xa4   :  { %vm89_vm2 = vcmp.eq.s32.totalorder %v87_v19, %v81_v18  ;;  %v3201_v18 = vld [vmem:[%s4157_s8 + $0x8] sm:$0xff]   ;;  %v3202_v19 = vld [vmem:[%s4158_s9] sm:$0xff]   ;;  %v294_v25 = vrot.slane %v3672_v21, %v3621_v4 }
  0xa5   :  { %vm2693_vm3 = vmpackc.low %vm89_vm2, %vm88_vm1 }
  0xa6   :  { %2907 = vmatmul.mubr.msk.bf16.vlgmr.msra.gmra.mrb[0].mxu0 %vm2693_vm3, %v3415_v20  ;;  %v216_v26 = vpop.permute.xlu1 %215  ;;  %v3203_v20 = vld [vmem:[%s4158_s9 + $0x8] sm:$0xff]  }
  0xa7   :  { %2942 = vmatprep.mubr.msk.bf16.mxu0 %vm3414_vm0, %v3413_v1  ;;  %v229_v30 = vpop.permute.xlu0 %228  ;;  %v219_v39 = vmul.f32 %v216_v26, %v207_v27 }
  0xa8   :  { %v236_v38 = vmul.f32 %v229_v30, %v225_v29 }
  0xaa   :  { %v234_v36 = vpop.permute.xlu1 %233 }
  0xab   :  { %v237_v43 = vmul.f32 %v234_v36, %v225_v29 }
 0x179   :  { %v195_v31 = vpop.f32.mrb[0].mxu0 }
 0x17a   :  { %v196_v34 = vadd.f32 %v195_v31, %v111_v28  ;;  %v2908_v35 = vpop.f32.mrb[1].mxu0 }
 0x17b   :  { %v198_v37 = vpop.f32.mrb[2].mxu0  ;;  %v358_v35 = vrot.slane %v3672_v21, %v3624_v5 }
 0x17c   :  { %v220_v40 = vadd.f32 %v218_v33, %v196_v34  ;;  %v199_v41 = vadd.f32 %v198_v37, %v112_v32  ;;  %v2909_v42 = vpop.f32.mrb[3].mxu0 }
 0x17e   :  { %v221_v44 = vadd.f32 %v219_v39, %v199_v41  ;;  %v238_v45 = vadd.f32 %v236_v38, %v220_v40 }
 0x180   :  { %v241_v46 = vsel %vm240_vm4, %v238_v45, 0.0  ;;  %v239_v47 = vadd.f32 %v237_v43, %v221_v44  ;;  %v419_v43 = vrot.slane %v3672_v21, %v3592_v23 }
 0x181   :  { %242 = vadd.xlane.f32.xlu0 %v241_v46 }
 0x182   :  { %v244_v48 = vsel %vm240_vm4, %v239_v47, 0.0 }
 0x183   :  { %245 = vadd.xlane.f32.xlu1 %v244_v48 }
 0x20e   :  { %v243_v49 = vpop.xlane.xlu0 %242 }
 0x20f   :  { %v248_v50 = vmul.f32 0.03125, %v243_v49 }
 0x210   :  { %v246_v51 = vpop.xlane.xlu1 %245 }
 0x211   :  { %v250_v52 = vsub.f32 %v238_v45, %v248_v50  ;;  %v249_v53 = vmul.f32 0.03125, %v246_v51 }
 0x213   :  { %v251_v54 = vsub.f32 %v239_v47, %v249_v53  ;;  %v252_v55 = vmul.f32 %v250_v52, %v250_v52 }
 0x215   :  { %v254_v56 = vsel %vm240_vm4, %v252_v55, 0.0  ;;  %v253_v57 = vmul.f32 %v251_v54, %v251_v54 }
 0x216   :  { %255 = vadd.xlane.f32.xlu0 %v254_v56 }
 0x217   :  { %v257_v58 = vsel %vm240_vm4, %v253_v57, 0.0 }
 0x21a   :  { %258 = vadd.xlane.f32.xlu0 %v257_v58 }
 0x2a3   :  { %v256_v61 = vpop.xlane.xlu0 %255 }
 0x2a4   :  { %v260_v62 = vmul.f32 0.03125, %v256_v61  ;;  %v3713_v61 = vld [vmem:[%s4180_s30] sm:$0xff] }
 0x2a6   :  { %v262_v63 = vadd.f32 1e-12, %v260_v62 }
 0x2a7   :  { %v259_v0 = vpop.xlane.xlu0 %258 }
 0x2a8   :  { %3234 = vrsqrt.f32 %v262_v63  ;;  %v261_v2 = vmul.f32 0.03125, %v259_v0  ;;  %v3718_v63 = vld [vmem:[%s4180_s30 + $0x8] sm:$0xff] }
 0x2aa   :  { %v263_v3 = vadd.f32 1e-12, %v261_v2 }
 0x2ac   :  { %3236 = vrsqrt.f32 %v263_v3 }
 0x2b2   :  { %v3235_v7 = vpop.eup %3234 }
 0x2b3   :  { %v266_v8 = vmul.f32 %v3235_v7, %v250_v52 }
 0x2b5   :  { %v272_v10 = vmul.f32 %v271_v6, %v266_v8 }
 0x2b6   :  { %v3237_v11 = vpop.eup %3236 }
 0x2b7   :  { %v267_v12 = vmul.f32 %v3237_v11, %v251_v54  ;;  %v3628_v13 = vadd.f32 %v277_v9, %v272_v10 }
 0x2b9   :  { %v273_v14 = vmul.f32 %v271_v6, %v267_v12  ;;  %280 = vst.msk [vmem:[%s4166_s17] sm:$0xff] %vm240_vm4, %v3628_v13 }
 0x2bb   :  { %v3635_v15 = vadd.f32 %v277_v9, %v273_v14 }
 0x2bd   :  { %281 = vst.msk [vmem:[%s4166_s17 + $0x8] sm:$0xff] %vm240_vm4, %v3635_v15  ;;  %v286_v17 = vpack.c.bf16 %v3635_v15, %v3628_v13 }
 0x2bf   :  { %2915 = vmatmul.mubr.msk.bf16.vlgmr.msra.gmra.mrb[0].mxu1 %vm240_vm4, %v286_v17 }
 0x2c0   :  { %2919 = vmatpush3.bf16.msra.mxu1 %v3200_v16  ;;  %2922 = vmatprep.mubr.msk.bf16.mxu1 %vm3414_vm0, %v3413_v1 }
 0x2c1   :  { %2920 = vmatprep.subr.bf16.mxu1 %v3413_v1 }
 0x2c4   :  { %2921 = vmatpush3.bf16.msra.mxu1 %v3201_v18 }
 0x2c5   :  { %2926 = vmatprep.subr.bf16.mxu1 %v3413_v1 }
 0x2c7   :  { %2923 = vmatmul.mubr.msk.bf16.vlgmr.msra.gmra.mrb[4].mxu1 %vm240_vm4, %v286_v17 }
 0x2c8   :  { %2927 = vmatpush3.bf16.msra.mxu1 %v3202_v19  ;;  %2930 = vmatprep.mubr.msk.bf16.mxu1 %vm3414_vm0, %v3413_v1 }
 0x2c9   :  { %2928 = vmatprep.subr.bf16.mxu1 %v3413_v1 }
 0x2cc   :  { %2929 = vmatpush3.bf16.msra.mxu1 %v3203_v20 }
 0x2cd   :  { %2934 = vmatprep.subr.bf16.mxu1 %v3413_v1 }
 0x2cf   :  { %2931 = vmatmul.mubr.msk.bf16.vlgmr.msra.gmra.mrb[8].mxu1 %vm240_vm4, %v286_v17 }
 0x2d0   :  { %2936 = vmatprep.mubr.msk.bf16.mxu1 %vm3414_vm0, %v3413_v1 }
 0x392   :  { %v344_v26 = vpop.f32.mrb[0].mxu1 }
 0x393   :  { %v345_v27 = vadd.f32 %v344_v26, %v294_v25  ;;  %v2916_v28 = vpop.f32.mrb[1].mxu1 }
 0x394   :  { %v347_v29 = vpop.f32.mrb[2].mxu1 }
 0x395   :  { %v348_v30 = vadd.f32 %v347_v29, %v294_v25  ;;  %v2917_v31 = vpop.f32.mrb[3].mxu1  ;;  %v473_v32 = vmul.f32 0.35355338, %v345_v27 }
 0x397   :  { %v474_v33 = vmul.f32 0.35355338, %v348_v30 }
 0x399   :  { %v475_v34 = vpack.c.bf16 %v474_v33, %v473_v32 }
 0x39a   :  { %v405_v36 = vpop.f32.mrb[4].mxu1 }
 0x39b   :  { %595 = vrot.lane.b32.xlu0 %v475_v34, %s3416_s0  ;;  %v2924_v37 = vpop.f32.mrb[5].mxu1  ;;  %v406_v39 = vadd.f32 %v405_v36, %v358_v35 }
 0x39c   :  { %v408_v38 = vpop.f32.mrb[6].mxu1 }
 0x39d   :  { %v409_v40 = vadd.f32 %v408_v38, %v358_v35  ;;  %v2925_v41 = vpop.f32.mrb[7].mxu1 }
 0x39f   :  { %v476_v42 = vpack.c.bf16 %v409_v40, %v406_v39 }
 0x3a1   :  { %841 = vrot.lane.b32.xlu0 %v476_v42, %s3417_s20  ;;  %598 = vrot.lane.b32.xlu1 %v476_v42, %s3416_s0  ;;  %v483_v44 = vsel %vm478_vm5, %v476_v42, 0 }
 0x3a2   :  { %v466_v45 = vpop.f32.mrb[8].mxu1  ;;  %2935 = vmatpush3.bf16.xpose.msra.mxu1 %v483_v44 }
 0x3a3   :  { %v2932_v46 = vpop.f32.mrb[9].mxu1  ;;  %2946 = vmatprep.subr.bf16.mxu1 %v3413_v1  ;;  %v467_v48 = vadd.f32 %v466_v45, %v419_v43 }
 0x3a4   :  { %v469_v47 = vpop.f32.mrb[10].mxu1 }
 0x3a5   :  { %v470_v49 = vadd.f32 %v469_v47, %v419_v43  ;;  %720 = vrot.lane.b32.xlu1 %v476_v42, %s3418_s21  ;;  %v2933_v50 = vpop.f32.mrb[11].mxu1 }
 0x3a7   :  { %v3686_v51 = vpack.c.bf16 %v470_v49, %v467_v48 }
 0x3a9   :  { %718 = vrot.lane.b32.xlu1 %v475_v34, %s3418_s21  ;;  %2937 = vmatmul.mubr.msk.bf16.vlgmr.msra.gmra.mrb[12].mxu1 %vm478_vm5, %v475_v34 }
 0x3aa   :  { %2941 = vmatpush3.bf16.msra.mxu0 %v3686_v51  ;;  %2948 = vmatprep.mubr.msk.bf16.mxu1 %vm3414_vm0, %v3413_v1 }
 0x3ab   :  { %2952 = vmatprep.subr.bf16.mxu0 %v3413_v1 }
 0x3ad   :  { %839 = vrot.lane.b32.xlu1 %v475_v34, %s3417_s20 }
 0x40d   :  { %v596_v55 = vpop.permute.xlu0 %595 }
 0x413   :  { %v599_v52 = vpop.permute.xlu1 %598  ;;  %v842_v57 = vpop.permute.xlu0 %841 }
 0x414   :  { %v604_v53 = vsel %vm478_vm5, %v599_v52, 0  ;;  %v847_v59 = vsel %vm478_vm5, %v842_v57, 0 }
 0x415   :  { %2947 = vmatpush3.bf16.xpose.msra.mxu1 %v604_v53 }
 0x416   :  { %2958 = vmatprep.subr.bf16.mxu1 %v3413_v1 }
 0x417   :  { %v721_v54 = vpop.permute.xlu1 %720 }
 0x418   :  { %v726_v56 = vsel %vm478_vm5, %v721_v54, 0 }
 0x41b   :  { %v719_v58 = vpop.permute.xlu1 %718 }
 0x41c   :  { %2949 = vmatmul.mubr.msk.bf16.vlgmr.msra.gmra.mrb[16].mxu1 %vm478_vm5, %v596_v55 }
 0x41d   :  { %2959 = vmatpush3.bf16.xpose.msra.mxu1 %v726_v56  ;;  %2960 = vmatprep.mubr.msk.bf16.mxu1 %vm3414_vm0, %v3413_v1 }
 0x41e   :  { %2970 = vmatprep.subr.bf16.mxu1 %v3413_v1 }
 0x41f   :  { %v840_v60 = vpop.permute.xlu1 %839 }
 0x424   :  { %2961 = vmatmul.mubr.msk.bf16.vlgmr.msra.gmra.mrb[20].mxu1 %vm478_vm5, %v719_v58 }
 0x425   :  { %2971 = vmatpush3.bf16.xpose.msra.mxu1 %v847_v59  ;;  %2972 = vmatprep.mubr.msk.bf16.mxu1 %vm3414_vm0, %v3413_v1 }
 0x426   :  { %2982 = vmatprep.subr.bf16.mxu1 %v3413_v1 }
 0x42c   :  { %2973 = vmatmul.mubr.msk.bf16.vlgmr.msra.gmra.mrb[24].mxu1 %vm478_vm5, %v840_v60 }
 0x42d   :  { %2986 = vmatprep.mubr.msk.bf16.mxu1 %vm3414_vm0, %v3413_v1 }
 0x47c   :  { %v519_v62 = vpop.f32.mrb[12].mxu1 }
 0x47d   :  { %v520_v0 = vadd.f32 %v519_v62, %v3713_v61  ;;  %v2938_v2 = vpop.f32.mrb[13].mxu1 }
 0x47e   :  { %v522_v3 = vpop.f32.mrb[14].mxu1 }
 0x47f   :  { %v523_v6 = vadd.f32 %v522_v3, %v3718_v63  ;;  %v2939_v7 = vpop.f32.mrb[15].mxu1  ;;  %v527_v8 = vsel %vm526_vm6, %v520_v0, -inf }
 0x480   :  { %528 = vmax.xlane.f32.xlu0 %v527_v8 }
 0x481   :  { %v530_v9 = vsel %vm526_vm6, %v523_v6, -inf }
 0x482   :  { %531 = vmax.xlane.f32.xlu1 %v530_v9 }
 0x4ef   :  { %v640_v10 = vpop.f32.mrb[16].mxu1 }
 0x4f0   :  { %v641_v11 = vadd.f32 %v640_v10, %v3713_v61  ;;  %v2950_v12 = vpop.f32.mrb[17].mxu1 }
 0x4f1   :  { %v643_v14 = vpop.f32.mrb[18].mxu1 }
 0x4f2   :  { %v644_v16 = vadd.f32 %v643_v14, %v3718_v63  ;;  %v2951_v17 = vpop.f32.mrb[19].mxu1  ;;  %v647_v18 = vsel %vm526_vm6, %v641_v11, -inf }
 0x4f3   :  { %648 = vmax.xlane.f32.xlu0 %v647_v18 }
 0x4f4   :  { %v650_v19 = vsel %vm526_vm6, %v644_v16, -inf }
 0x4f7   :  { %651 = vmax.xlane.f32.xlu0 %v650_v19  ;;  %v762_v20 = vpop.f32.mrb[20].mxu1 }
 0x4f8   :  { %v763_v25 = vadd.f32 %v762_v20, %v3713_v61  ;;  %v2962_v26 = vpop.f32.mrb[21].mxu1 }
 0x4f9   :  { %v765_v27 = vpop.f32.mrb[22].mxu1 }
 0x4fa   :  { %v766_v28 = vadd.f32 %v765_v27, %v3718_v63  ;;  %v2963_v29 = vpop.f32.mrb[23].mxu1  ;;  %v769_v30 = vsel %vm526_vm6, %v763_v25, -inf }
 0x4fb   :  { %770 = vmax.xlane.f32.xlu1 %v769_v30 }
 0x4fc   :  { %v772_v31 = vsel %vm526_vm6, %v766_v28, -inf }
 0x4fd   :  { %773 = vmax.xlane.f32.xlu0 %v772_v31 }
 0x4ff   :  { %v883_v32 = vpop.f32.mrb[24].mxu1 }
 0x500   :  { %v884_v33 = vadd.f32 %v883_v32, %v3713_v61  ;;  %v2974_v34 = vpop.f32.mrb[25].mxu1 }
 0x501   :  { %v886_v35 = vpop.f32.mrb[26].mxu1 }
 0x502   :  { %v887_v36 = vadd.f32 %v886_v35, %v3718_v63  ;;  %v2975_v37 = vpop.f32.mrb[27].mxu1  ;;  %v890_v38 = vsel %vm526_vm6, %v884_v33, -inf }
 0x503   :  { %891 = vmax.xlane.f32.xlu1 %v890_v38 }
 0x504   :  { %v893_v39 = vsel %vm526_vm6, %v887_v36, -inf }
 0x505   :  { %894 = vmax.xlane.f32.xlu0 %v893_v39 }
 0x50d   :  { %v529_v40 = vpop.xlane.xlu0 %528 }
 0x50e   :  { %v533_v41 = vsub.f32 %v520_v0, %v529_v40 }
 0x50f   :  { %v532_v42 = vpop.xlane.xlu1 %531 }
 0x510   :  { %v535_v43 = vmul.f32 1.442695, %v533_v41  ;;  %v534_v44 = vsub.f32 %v523_v6, %v532_v42 }
 0x512   :  { %3238 = vpow2.f32 %v535_v43  ;;  %v537_v45 = vmul.f32 1.442695, %v534_v44 }
 0x514   :  { %3240 = vpow2.f32 %v537_v45 }
 0x51c   :  { %v3239_v46 = vpop.eup %3238 }
 0x51d   :  { %v539_v47 = vsel %vm526_vm6, %v3239_v46, 0.0 }
 0x51e   :  { %v3241_v48 = vpop.eup %3240  ;;  %540 = vadd.xlane.f32.xlu1 %v539_v47 }
 0x51f   :  { %v542_v49 = vsel %vm526_vm6, %v3241_v48, 0.0 }
 0x520   :  { %543 = vadd.xlane.f32.xlu0 %v542_v49 }
 0x52f   :  { %671 = vrot.lane.b32.xlu1 %v3686_v51, %s3416_s0 }
 0x580   :  { %v649_v50 = vpop.xlane.xlu0 %648 }
 0x581   :  { %v653_v52 = vsub.f32 %v641_v11, %v649_v50 }
 0x583   :  { %v655_v53 = vmul.f32 1.442695, %v653_v52 }
 0x584   :  { %v652_v54 = vpop.xlane.xlu0 %651 }
 0x585   :  { %3242 = vpow2.f32 %v655_v53  ;;  %v654_v55 = vsub.f32 %v644_v16, %v652_v54 }
 0x587   :  { %v657_v56 = vmul.f32 1.442695, %v654_v55 }
 0x588   :  { %v771_v57 = vpop.xlane.xlu1 %770 }
 0x589   :  { %3244 = vpow2.f32 %v657_v56  ;;  %v775_v58 = vsub.f32 %v763_v25, %v771_v57 }
 0x58a   :  { %v774_v59 = vpop.xlane.xlu0 %773 }
 0x58b   :  { %v777_v60 = vmul.f32 1.442695, %v775_v58  ;;  %v776_v62 = vsub.f32 %v766_v28, %v774_v59 }
 0x58d   :  { %3246 = vpow2.f32 %v777_v60  ;;  %v779_v0 = vmul.f32 1.442695, %v776_v62 }
 0x58f   :  { %v3243_v2 = vpop.eup %3242  ;;  %3248 = vpow2.f32 %v779_v0 }
 0x590   :  { %v892_v3 = vpop.xlane.xlu1 %891  ;;  %v659_v6 = vsel %vm526_vm6, %v3243_v2, 0.0 }
 0x591   :  { %v896_v7 = vsub.f32 %v884_v33, %v892_v3  ;;  %660 = vadd.xlane.f32.xlu1 %v659_v6 }
 0x592   :  { %v895_v8 = vpop.xlane.xlu0 %894 }
 0x593   :  { %v3245_v9 = vpop.eup %3244  ;;  %v898_v10 = vmul.f32 1.442695, %v896_v7  ;;  %v897_v11 = vsub.f32 %v887_v36, %v895_v8  ;;  %v3204_v7 = vld [vmem:[%s4159_s10] sm:$0xff]  }
 0x594   :  { %v662_v12 = vsel %vm526_vm6, %v3245_v9, 0.0  ;;  %2983 = vmatpush3.bf16.msra.mxu1 %v3204_v7 }
 0x595   :  { %3250 = vpow2.f32 %v898_v10  ;;  %v900_v14 = vmul.f32 1.442695, %v897_v11  ;;  %663 = vadd.xlane.f32.xlu0 %v662_v12  ;;  %2984 = vmatprep.subr.bf16.mxu1 %v3413_v1  ;;  %v3205_v12 = vld [vmem:[%s4159_s10 + $0x8] sm:$0xff]  }
 0x597   :  { %v3247_v16 = vpop.eup %3246  ;;  %3252 = vpow2.f32 %v900_v14 }
 0x598   :  { %v781_v17 = vsel %vm526_vm6, %v3247_v16, 0.0  ;;  %2985 = vmatpush3.bf16.msra.mxu1 %v3205_v12 }
 0x599   :  { %v3249_v18 = vpop.eup %3248  ;;  %782 = vadd.xlane.f32.xlu1 %v781_v17  ;;  %2998 = vmatprep.subr.bf16.mxu1 %v3413_v1 }
 0x59a   :  { %v784_v19 = vsel %vm526_vm6, %v3249_v18, 0.0 }
 0x59b   :  { %785 = vadd.xlane.f32.xlu0 %v784_v19 }
 0x59f   :  { %v3251_v20 = vpop.eup %3250 }
 0x5a0   :  { %v902_v25 = vsel %vm526_vm6, %v3251_v20, 0.0 }
 0x5a1   :  { %v3253_v26 = vpop.eup %3252  ;;  %903 = vadd.xlane.f32.xlu1 %v902_v25 }
 0x5a2   :  { %v905_v27 = vsel %vm526_vm6, %v3253_v26, 0.0 }
 0x5a3   :  { %906 = vadd.xlane.f32.xlu0 %v905_v27 }
 0x5ab   :  { %v541_v28 = vpop.xlane.xlu1 %540 }
 0x5ac   :  { %3254 = vrcp.f32 %v541_v28 }
 0x5ad   :  { %v544_v29 = vpop.xlane.xlu0 %543 }
 0x5ae   :  { %3256 = vrcp.f32 %v544_v29 }
 0x5af   :  { %v672_v35 = vpop.permute.xlu1 %671 }
 0x5b2   :  { %913 = vrot.lane.b32.xlu1 %v3686_v51, %s3417_s20 }
 0x5b6   :  { %v3255_v30 = vpop.eup %3254 }
 0x5b7   :  { %v547_v32 = vmul.f32 %v3255_v30, %v3239_v46 }
 0x5b8   :  { %v3257_v31 = vpop.eup %3256 }
 0x5b9   :  { %v548_v33 = vmul.f32 %v3257_v31, %v3241_v48  ;;  %792 = vrot.lane.b32.xlu0 %v3686_v51, %s3418_s21 }
 0x5bb   :  { %v549_v34 = vpack.c.bf16 %v548_v33, %v547_v32 }
 0x5bd   :  { %2943 = vmatmul.mubr.msk.bf16.vlgmr.msra.gmra.mrb[4].mxu0 %vm526_vm6, %v549_v34 }
 0x5be   :  { %2953 = vmatpush3.bf16.msra.mxu0 %v672_v35  ;;  %2954 = vmatprep.mubr.msk.bf16.mxu0 %vm3414_vm0, %v3413_v1 }
 0x5bf   :  { %2964 = vmatprep.subr.bf16.mxu0 %v3413_v1 }
 0x61e   :  { %v661_v36 = vpop.xlane.xlu1 %660 }
 0x61f   :  { %3258 = vrcp.f32 %v661_v36 }
 0x622   :  { %v664_v37 = vpop.xlane.xlu0 %663 }
 0x623   :  { %3260 = vrcp.f32 %v664_v37 }
 0x626   :  { %v783_v38 = vpop.xlane.xlu1 %782 }
 0x627   :  { %3262 = vrcp.f32 %v783_v38 }
 0x628   :  { %v786_v39 = vpop.xlane.xlu0 %785 }
 0x629   :  { %3264 = vrcp.f32 %v786_v39  ;;  %v3259_v40 = vpop.eup %3258 }
 0x62a   :  { %v667_v41 = vmul.f32 %v3259_v40, %v3243_v2 }
 0x62d   :  { %v3261_v51 = vpop.eup %3260 }
 0x62e   :  { %v668_v42 = vmul.f32 %v3261_v51, %v3245_v9  ;;  %v904_v43 = vpop.xlane.xlu1 %903 }
 0x62f   :  { %3266 = vrcp.f32 %v904_v43 }
 0x630   :  { %v907_v44 = vpop.xlane.xlu0 %906  ;;  %v669_v45 = vpack.c.bf16 %v668_v42, %v667_v41  ;;  %v999_v42 = vrot.slane %v3672_v21, %v3595_v24 }
 0x631   :  { %3268 = vrcp.f32 %v907_v44  ;;  %v3263_v46 = vpop.eup %3262 }
 0x632   :  { %2955 = vmatmul.mubr.msk.bf16.vlgmr.msra.gmra.mrb[8].mxu0 %vm526_vm6, %v669_v45  ;;  %v789_v50 = vmul.f32 %v3263_v46, %v3247_v16  ;;  %v914_v54 = vpop.permute.xlu1 %913 }
 0x633   :  { %v3265_v47 = vpop.eup %3264  ;;  %2966 = vmatprep.mubr.msk.bf16.mxu0 %vm3414_vm0, %v3413_v1 }
 0x634   :  { %v790_v48 = vmul.f32 %v3265_v47, %v3249_v18  ;;  %v793_v49 = vpop.permute.xlu0 %792 }
 0x635   :  { %2965 = vmatpush3.bf16.msra.mxu0 %v793_v49 }
 0x636   :  { %2976 = vmatprep.subr.bf16.mxu0 %v3413_v1  ;;  %v791_v52 = vpack.c.bf16 %v790_v48, %v789_v50 }
 0x639   :  { %v3267_v53 = vpop.eup %3266 }
 0x63a   :  { %2967 = vmatmul.mubr.msk.bf16.vlgmr.msra.gmra.mrb[12].mxu0 %vm526_vm6, %v791_v52  ;;  %v910_v57 = vmul.f32 %v3267_v53, %v3251_v20 }
 0x63b   :  { %v3269_v55 = vpop.eup %3268  ;;  %2977 = vmatpush3.bf16.msra.mxu0 %v914_v54  ;;  %2978 = vmatprep.mubr.msk.bf16.mxu0 %vm3414_vm0, %v3413_v1 }
 0x63c   :  { %v911_v56 = vmul.f32 %v3269_v55, %v3253_v26  ;;  %2990 = vmatprep.subr.bf16.mxu0 %v3413_v1 }
 0x63e   :  { %v912_v58 = vpack.c.bf16 %v911_v56, %v910_v57 }
 0x642   :  { %2979 = vmatmul.mubr.msk.bf16.vlgmr.msra.gmra.mrb[16].mxu0 %vm526_vm6, %v912_v58 }
 0x643   :  { %2994 = vmatprep.mubr.msk.bf16.mxu0 %vm3414_vm0, %v3413_v1 }
 0x690   :  { %v587_v59 = vpop.f32.mrb[4].mxu0 }
 0x691   :  { %v2944_v60 = vpop.f32.mrb[5].mxu0 }
 0x692   :  { %v590_v62 = vpop.f32.mrb[6].mxu0 }
 0x693   :  { %v2945_v0 = vpop.f32.mrb[7].mxu0 }
 0x705   :  { %v711_v2 = vpop.f32.mrb[8].mxu0 }
 0x706   :  { %v2956_v3 = vpop.f32.mrb[9].mxu0 }
 0x707   :  { %v714_v6 = vpop.f32.mrb[10].mxu0 }
 0x708   :  { %v3160_v8 = vpack.i.bf16 %v714_v6, %v711_v2  ;;  %v2957_v9 = vpop.f32.mrb[11].mxu0  ;;  %v3207_v2 = vld [vmem:[%s4160_s11 + $0x8] sm:$0xff]  }
 0x70a   :  { %3161 = vrot.lane.b32.xlu1 %v3160_v8, %s3419_s24 }
 0x70d   :  { %v832_v10 = vpop.f32.mrb[12].mxu0 }
 0x70e   :  { %v2968_v11 = vpop.f32.mrb[13].mxu0 }
 0x70f   :  { %v835_v14 = vpop.f32.mrb[14].mxu0  ;;  %v3802_v11 = vsub.s32 4, %v3589_v22 }
 0x710   :  { %v3165_v16 = vpack.i.bf16 %v835_v14, %v832_v10  ;;  %v2969_v17 = vpop.f32.mrb[15].mxu0 }
 0x711   :  { %v1087_v14 = vrot.slane %v3672_v21, %v3802_v11  ;;  %v3807_v17 = vsub.s32 5, %v3589_v22 }
 0x712   :  { %3166 = vrot.lane.b32.xlu0 %v3165_v16, %s3420_s26 }
 0x715   :  { %v953_v18 = vpop.f32.mrb[16].mxu0 }
 0x716   :  { %v2980_v19 = vpop.f32.mrb[17].mxu0 }
 0x717   :  { %v956_v20 = vpop.f32.mrb[18].mxu0 }
 0x718   :  { %v3170_v25 = vpack.i.bf16 %v956_v20, %v953_v18  ;;  %v2981_v26 = vpop.f32.mrb[19].mxu0 }
 0x71a   :  { %3171 = vrot.lane.b32.xlu1 %v3170_v25, %s3421_s27  ;;  %v1093_v25 = vrot.slane %v3672_v21, %v3807_v17 }
 0x77c   :  { %v3162_v27 = vpop.permute.xlu1 %3161 }
 0x77d   :  { %v3164_v29 = vunpack.i.h.bf16 %v3162_v27  ;;  %v3163_v30 = vunpack.i.l.bf16 %v3162_v27 }
 0x77f   :  { %v985_v34 = vsel %vm478_vm5, %v590_v62, %v3164_v29  ;;  %v984_v35 = vsel %vm478_vm5, %v587_v59, %v3163_v30  ;;  %v3208_v30 = vld [vmem:[%s4161_s12] sm:$0xff]  }
 0x784   :  { %v3167_v28 = vpop.permute.xlu0 %3166 }
 0x785   :  { %v3169_v31 = vunpack.i.h.bf16 %v3167_v28  ;;  %v3168_v32 = vunpack.i.l.bf16 %v3167_v28 }
 0x787   :  { %v987_v38 = vsel %vm526_vm6, %v985_v34, %v3169_v31  ;;  %v986_v39 = vsel %vm526_vm6, %v984_v35, %v3168_v32  ;;  %v3209_v31 = vld [vmem:[%s4161_s12 + $0x8] sm:$0xff]   ;;  %v3210_v32 = vld [vmem:[%s4161_s12 + $0x10] sm:$0xff]   ;;  %v3831_v34 = vsub.s32 6, %v3589_v22 }
 0x789   :  { %v1104_v35 = vrot.slane %v3672_v21, %v3831_v34 }
 0x78c   :  { %v3172_v33 = vpop.permute.xlu1 %3171 }
 0x78d   :  { %v3174_v36 = vunpack.i.h.bf16 %v3172_v33  ;;  %v3173_v37 = vunpack.i.l.bf16 %v3172_v33  ;;  %v3211_v33 = vld [vmem:[%s4161_s12 + $0x18] sm:$0xff]  }
 0x78f   :  { %v990_v40 = vsel %vm988_vm7, %v987_v38, %v3174_v36  ;;  %v989_v51 = vsel %vm988_vm7, %v986_v39, %v3173_v37 }
 0x790   :  { %v991_v41 = vpack.c.bf16 %v990_v40, %v989_v51 }
 0x792   :  { %2987 = vmatmul.mubr.msk.bf16.vlgmr.msra.gmra.mrb[28].mxu1 %vm240_vm4, %v991_v41 }
 0x793   :  { %3006 = vmatprep.mubr.msk.bf16.mxu1 %vm3414_vm0, %v3413_v1  ;;  %2999 = vmatpush3.bf16.msra.mxu1 %v3208_v30  ;;  %v3214_v30 = vld [vmem:[%s4156_s7 + $0x18] sm:$0xff]  }
 0x794   :  { %3000 = vmatprep.subr.bf16.mxu1 %v3413_v1 }
 0x797   :  { %3001 = vmatpush3.bf16.msra.mxu1 %v3209_v31  ;;  %v3215_v31 = vld [vmem:[%s4158_s9 + $0x18] sm:$0xff]  }
 0x798   :  { %3002 = vmatprep.subr.bf16.mxu1 %v3413_v1 }
 0x79b   :  { %3003 = vmatpush3.bf16.msra.mxu1 %v3210_v32 }
 0x79c   :  { %3004 = vmatprep.subr.bf16.mxu1 %v3413_v1 }
 0x79f   :  { %3005 = vmatpush3.bf16.msra.mxu1 %v3211_v33 }
 0x7a0   :  { %3026 = vmatprep.subr.bf16.mxu1 %v3413_v1 }
 0x865   :  { %v1049_v43 = vpop.f32.mrb[28].mxu1 }
 0x866   :  { %v1050_v44 = vadd.f32 %v1049_v43, %v999_v42  ;;  %v2988_v45 = vpop.f32.mrb[29].mxu1 }
 0x867   :  { %v1052_v46 = vpop.f32.mrb[30].mxu1 }
 0x868   :  { %v1053_v47 = vadd.f32 %v1052_v46, %v999_v42  ;;  %v2989_v48 = vpop.f32.mrb[31].mxu1  ;;  %v1056_v49 = vadd.f32 %v1050_v44, %v3628_v13 }
 0x86a   :  { %v1058_v50 = vsel %vm240_vm4, %v1056_v49, 0.0  ;;  %v1057_v52 = vadd.f32 %v1053_v47, %v3635_v15  ;;  %v3206_v15 = vld [vmem:[%s4160_s11] sm:$0xff]  }
 0x86b   :  { %1059 = vadd.xlane.f32.xlu0 %v1058_v50  ;;  %2991 = vmatpush3.bf16.msra.mxu0 %v3206_v15 }
 0x86c   :  { %v1061_v53 = vsel %vm240_vm4, %v1057_v52, 0.0  ;;  %2992 = vmatprep.subr.bf16.mxu0 %v3413_v1 }
 0x86d   :  { %1062 = vadd.xlane.f32.xlu1 %v1061_v53 }
 0x86f   :  { %2993 = vmatpush3.bf16.msra.mxu0 %v3207_v2 }
 0x870   :  { %3010 = vmatprep.subr.bf16.mxu0 %v3413_v1 }
 0x8f8   :  { %v1060_v54 = vpop.xlane.xlu0 %1059 }
 0x8f9   :  { %v1064_v55 = vmul.f32 0.03125, %v1060_v54 }
 0x8fa   :  { %v1063_v56 = vpop.xlane.xlu1 %1062 }
 0x8fb   :  { %v1066_v57 = vsub.f32 %v1056_v49, %v1064_v55  ;;  %v1065_v58 = vmul.f32 0.03125, %v1063_v56 }
 0x8fd   :  { %v1067_v59 = vsub.f32 %v1057_v52, %v1065_v58  ;;  %v1068_v60 = vmul.f32 %v1066_v57, %v1066_v57 }
 0x8ff   :  { %v1070_v62 = vsel %vm240_vm4, %v1068_v60, 0.0  ;;  %v1069_v0 = vmul.f32 %v1067_v59, %v1067_v59 }
 0x900   :  { %1071 = vadd.xlane.f32.xlu0 %v1070_v62  ;;  %v3839_v62 = vsub.s32 7, %v3589_v22 }
 0x901   :  { %v1073_v13 = vsel %vm240_vm4, %v1069_v0, 0.0 }
 0x902   :  { %v1191_v0 = vrot.slane %v3672_v21, %v3839_v62 }
 0x904   :  { %1074 = vadd.xlane.f32.xlu0 %v1073_v13 }
 0x98d   :  { %v1072_v3 = vpop.xlane.xlu0 %1071 }
 0x98e   :  { %v1076_v6 = vmul.f32 0.03125, %v1072_v3 }
 0x990   :  { %v1078_v7 = vadd.f32 1e-12, %v1076_v6 }
 0x991   :  { %v1075_v8 = vpop.xlane.xlu0 %1074 }
 0x992   :  { %3270 = vrsqrt.f32 %v1078_v7  ;;  %v1077_v9 = vmul.f32 0.03125, %v1075_v8 }
 0x994   :  { %v1079_v10 = vadd.f32 1e-12, %v1077_v9 }
 0x996   :  { %3272 = vrsqrt.f32 %v1079_v10 }
 0x99c   :  { %v3271_v12 = vpop.eup %3270 }
 0x99d   :  { %v1082_v16 = vmul.f32 %v3271_v12, %v1066_v57 }
 0x99f   :  { %v1088_v19 = vmul.f32 %v1087_v14, %v1082_v16 }
 0x9a0   :  { %v3273_v18 = vpop.eup %3272 }
 0x9a1   :  { %v1083_v20 = vmul.f32 %v3273_v18, %v1067_v59  ;;  %v1094_v27 = vadd.f32 %v1093_v25, %v1088_v19 }
 0x9a3   :  { %v1089_v26 = vmul.f32 %v1087_v14, %v1083_v20 }
 0x9a5   :  { %v1095_v28 = vadd.f32 %v1093_v25, %v1089_v26 }
 0x9a7   :  { %v1096_v29 = vpack.c.bf16 %v1095_v28, %v1094_v27 }
 0x9a9   :  { %2995 = vmatmul.mubr.msk.bf16.vlgmr.msra.gmra.mrb[20].mxu0 %vm240_vm4, %v1096_v29  ;;  %v3213_v29 = vld [vmem:[%s4158_s9 + $0x10] sm:$0xff]  }
 0x9aa   :  { %3014 = vmatprep.mubr.msk.bf16.mxu0 %vm3414_vm0, %v3413_v1 }
 0xa7c   :  { %v1154_v36 = vpop.f32.mrb[20].mxu0 }
 0xa7d   :  { %v1155_v37 = vadd.f32 %v1154_v36, %v1104_v35  ;;  %v2996_v38 = vpop.f32.mrb[21].mxu0 }
 0xa7e   :  { %v1157_v39 = vpop.f32.mrb[22].mxu0 }
 0xa7f   :  { %v1163_v40 = vmul.f32 0.044715, %v1155_v37  ;;  %v1158_v51 = vadd.f32 %v1157_v39, %v1104_v35  ;;  %v2997_v41 = vpop.f32.mrb[23].mxu0  ;;  %v1161_v55 = vmul.f32 0.5, %v1155_v37  ;;  %v285_v39 = vld [vmem:[%s4162_s13 + $0x8] sm:$0x3] }
 0xa81   :  { %v1165_v42 = vmul.f32 %v1163_v40, %v1155_v37  ;;  %v1164_v43 = vmul.f32 0.044715, %v1158_v51  ;;  %v1162_v56 = vmul.f32 0.5, %v1158_v51  ;;  %v1292_v40 = vrot.slane %v285_v39, %v3621_v4 }
 0xa83   :  { %v1167_v44 = vmul.f32 %v1165_v42, %v1155_v37  ;;  %v1166_v45 = vmul.f32 %v1164_v43, %v1158_v51  ;;  %v1298_v42 = vrot.slane %v285_v39, %v3624_v5 }
 0xa85   :  { %v1169_v46 = vadd.f32 %v1167_v44, %v1155_v37  ;;  %v1168_v47 = vmul.f32 %v1166_v45, %v1158_v51 }
 0xa87   :  { %v1171_v48 = vmul.f32 0.7978846, %v1169_v46  ;;  %v1170_v49 = vadd.f32 %v1168_v47, %v1158_v51 }
 0xa89   :  { %3274 = vtanh.f32 %v1171_v48  ;;  %v1172_v50 = vmul.f32 0.7978846, %v1170_v49  ;;  %v3216_v49 = vld [vmem:[%s4157_s8 + $0x10] sm:$0xff]  }
 0xa8b   :  { %3276 = vtanh.f32 %v1172_v50 }
 0xa93   :  { %v3275_v52 = vpop.eup %3274 }
 0xa94   :  { %v1175_v53 = vadd.f32 1.0, %v3275_v52  ;;  %v3217_v52 = vld [vmem:[%s4157_s8 + $0x18] sm:$0xff]  }
 0xa95   :  { %v3277_v54 = vpop.eup %3276 }
 0xa96   :  { %v1176_v57 = vadd.f32 1.0, %v3277_v54  ;;  %v1177_v58 = vmul.f32 %v1175_v53, %v1161_v55  ;;  %v3904_v53 = vld [vmem:[%s4162_s13 + $0x10] sm:$0xff] }
 0xa97   :  { %v1316_v54 = vrot.slane %v3904_v53, %v3621_v4  ;;  %v1443_v55 = vrot.slane %v3904_v53, %v3592_v23  ;;  %v1381_v23 = vrot.slane %v3904_v53, %v3624_v5 }
 0xa98   :  { %v1178_v59 = vmul.f32 %v1176_v57, %v1162_v56 }
 0xa9a   :  { %v1179_v60 = vpack.c.bf16 %v1178_v59, %v1177_v58 }
 0xa9c   :  { %3007 = vmatmul.mubr.msk.bf16.vlgmr.msra.gmra.mrb[32].mxu1 %vm1216_vm8, %v1179_v60 }
 0xa9d   :  { %3030 = vmatprep.mubr.msk.bf16.mxu1 %vm3414_vm0, %v3413_v1  ;;  %3027 = vmatpush3.bf16.msra.mxu1 %v3213_v29 }
 0xa9e   :  { %3028 = vmatprep.subr.bf16.mxu1 %v3413_v1 }
 0xaa1   :  { %3029 = vmatpush3.bf16.msra.mxu1 %v3215_v31 }
 0xaa2   :  { %3040 = vmatprep.subr.bf16.mxu1 %v3413_v1 }
 0xb6f   :  { %v1254_v13 = vpop.f32.mrb[32].mxu1 }
 0xb70   :  { %v1255_v15 = vadd.f32 %v1254_v13, %v1191_v0  ;;  %v3008_v2 = vpop.f32.mrb[33].mxu1 }
 0xb71   :  { %v1257_v3 = vpop.f32.mrb[34].mxu1 }
 0xb72   :  { %v1258_v6 = vadd.f32 %v1257_v3, %v1191_v0  ;;  %v3009_v7 = vpop.f32.mrb[35].mxu1  ;;  %v1261_v8 = vadd.f32 %v1255_v15, %v1094_v27 }
 0xb74   :  { %v1263_v9 = vsel %vm240_vm4, %v1261_v8, 0.0  ;;  %v1262_v10 = vadd.f32 %v1258_v6, %v1095_v28  ;;  %v3212_v28 = vld [vmem:[%s4156_s7 + $0x10] sm:$0xff]  }
 0xb75   :  { %1264 = vadd.xlane.f32.xlu1 %v1263_v9  ;;  %3011 = vmatpush3.bf16.msra.mxu0 %v3212_v28 }
 0xb76   :  { %v1266_v12 = vsel %vm240_vm4, %v1262_v10, 0.0  ;;  %3012 = vmatprep.subr.bf16.mxu0 %v3413_v1 }
 0xb77   :  { %1267 = vadd.xlane.f32.xlu0 %v1266_v12 }
 0xb79   :  { %3013 = vmatpush3.bf16.msra.mxu0 %v3214_v30 }
 0xb7a   :  { %3018 = vmatprep.subr.bf16.mxu0 %v3413_v1 }
 0xc02   :  { %v1265_v14 = vpop.xlane.xlu1 %1264 }
 0xc03   :  { %v1269_v22 = vmul.f32 0.03125, %v1265_v14 }
 0xc04   :  { %v1268_v16 = vpop.xlane.xlu0 %1267 }
 0xc05   :  { %v1271_v18 = vsub.f32 %v1261_v8, %v1269_v22  ;;  %v1270_v19 = vmul.f32 0.03125, %v1268_v16 }
 0xc07   :  { %v1272_v21 = vsub.f32 %v1262_v10, %v1270_v19  ;;  %v1273_v20 = vmul.f32 %v1271_v18, %v1271_v18 }
 0xc09   :  { %v1275_v25 = vsel %vm240_vm4, %v1273_v20, 0.0  ;;  %v1274_v26 = vmul.f32 %v1272_v21, %v1272_v21 }
 0xc0a   :  { %1276 = vadd.xlane.f32.xlu1 %v1275_v25 }
 0xc0b   :  { %v1278_v27 = vsel %vm240_vm4, %v1274_v26, 0.0 }
 0xc0c   :  { %1279 = vadd.xlane.f32.xlu0 %v1278_v27 }
 0xc97   :  { %v1277_v32 = vpop.xlane.xlu1 %1276 }
 0xc98   :  { %v1281_v33 = vmul.f32 0.03125, %v1277_v32 }
 0xc99   :  { %v1280_v35 = vpop.xlane.xlu0 %1279 }
 0xc9a   :  { %v1283_v36 = vadd.f32 1e-12, %v1281_v33  ;;  %v1282_v37 = vmul.f32 0.03125, %v1280_v35 }
 0xc9c   :  { %3278 = vrsqrt.f32 %v1283_v36  ;;  %v1284_v38 = vadd.f32 1e-12, %v1282_v37 }
 0xc9e   :  { %3280 = vrsqrt.f32 %v1284_v38 }
 0xca6   :  { %v3279_v51 = vpop.eup %3278 }
 0xca7   :  { %v1287_v41 = vmul.f32 %v3279_v51, %v1271_v18 }
 0xca8   :  { %v3281_v43 = vpop.eup %3280 }
 0xca9   :  { %v1293_v44 = vmul.f32 %v1292_v40, %v1287_v41  ;;  %v1288_v45 = vmul.f32 %v3281_v43, %v1272_v21 }
 0xcab   :  { %v1294_v46 = vmul.f32 %v1292_v40, %v1288_v45  ;;  %v3868_v47 = vadd.f32 %v1298_v42, %v1293_v44 }
 0xcad   :  { %v3870_v48 = vadd.f32 %v1298_v42, %v1294_v46  ;;  %2723 = vst.msk [vmem:[%s4166_s17 + $0x10] sm:$0xff] %vm240_vm4, %v3868_v47 }
 0xcaf   :  { %2724 = vst.msk [vmem:[%s4166_s17 + $0x18] sm:$0xff] %vm240_vm4, %v3870_v48  ;;  %v1307_v50 = vpack.c.bf16 %v3870_v48, %v3868_v47 }
 0xcb1   :  { %3015 = vmatmul.mubr.msk.bf16.vlgmr.msra.gmra.mrb[24].mxu0 %vm240_vm4, %v1307_v50  ;;  %3031 = vmatmul.mubr.msk.bf16.vlgmr.msra.gmra.mrb[36].mxu1 %vm240_vm4, %v1307_v50 }
 0xcb2   :  { %3019 = vmatpush3.bf16.msra.mxu0 %v3216_v49  ;;  %3022 = vmatprep.mubr.msk.bf16.mxu0 %vm3414_vm0, %v3413_v1 }
 0xcb3   :  { %3020 = vmatprep.subr.bf16.mxu0 %v3413_v1  ;;  %3042 = vmatprep.mubr.msk.bf16.mxu1 %vm3414_vm0, %v3413_v1 }
 0xcb6   :  { %3021 = vmatpush3.bf16.msra.mxu0 %v3217_v52 }
 0xcb7   :  { %3034 = vmatprep.subr.bf16.mxu0 %v3413_v1 }
 0xcb9   :  { %3023 = vmatmul.mubr.msk.bf16.vlgmr.msra.gmra.mrb[28].mxu0 %vm240_vm4, %v1307_v50 }
 0xcba   :  { %3036 = vmatprep.mubr.msk.bf16.mxu0 %vm3414_vm0, %v3413_v1 }
 0xd84   :  { %v1366_v56 = vpop.f32.mrb[24].mxu0  ;;  %v1490_v57 = vpop.f32.mrb[36].mxu1 }
 0xd85   :  { %v1367_v58 = vadd.f32 %v1366_v56, %v1316_v54  ;;  %v3016_v59 = vpop.f32.mrb[25].mxu0  ;;  %v3032_v60 = vpop.f32.mrb[37].mxu1  ;;  %v1491_v15 = vadd.f32 %v1490_v57, %v1443_v55 }
 0xd86   :  { %v1369_v0 = vpop.f32.mrb[26].mxu0  ;;  %v1493_v13 = vpop.f32.mrb[38].mxu1 }
 0xd87   :  { %v1370_v2 = vadd.f32 %v1369_v0, %v1316_v54  ;;  %v1494_v3 = vadd.f32 %v1493_v13, %v1443_v55  ;;  %v3017_v6 = vpop.f32.mrb[27].mxu0  ;;  %v3033_v7 = vpop.f32.mrb[39].mxu1  ;;  %v1497_v8 = vmul.f32 0.35355338, %v1367_v58 }
 0xd89   :  { %v1498_v9 = vmul.f32 0.35355338, %v1370_v2  ;;  %v3910_v10 = vpack.c.bf16 %v1494_v3, %v1491_v15 }
 0xd8b   :  { %v1499_v12 = vpack.c.bf16 %v1498_v9, %v1497_v8  ;;  %3041 = vmatpush3.bf16.msra.mxu1 %v3910_v10 }
 0xd8c   :  { %v1428_v14 = vpop.f32.mrb[28].mxu0  ;;  %3052 = vmatprep.subr.bf16.mxu1 %v3413_v1 }
 0xd8d   :  { %1617 = vrot.lane.b32.xlu0 %v1499_v12, %s3416_s0  ;;  %v3024_v22 = vpop.f32.mrb[29].mxu0  ;;  %v1429_v18 = vadd.f32 %v1428_v14, %v1381_v23 }
 0xd8e   :  { %v1431_v16 = vpop.f32.mrb[30].mxu0 }
 0xd8f   :  { %v1432_v19 = vadd.f32 %v1431_v16, %v1381_v23  ;;  %v3025_v21 = vpop.f32.mrb[31].mxu0 }
 0xd91   :  { %v1500_v20 = vpack.c.bf16 %v1432_v19, %v1429_v18 }
 0xd93   :  { %1863 = vrot.lane.b32.xlu0 %v1500_v20, %s3417_s20  ;;  %1620 = vrot.lane.b32.xlu1 %v1500_v20, %s3416_s0  ;;  %v1506_v25 = vsel %vm478_vm5, %v1500_v20, 0 }
 0xd94   :  { %3035 = vmatpush3.bf16.xpose.msra.mxu0 %v1506_v25 }
 0xd95   :  { %3046 = vmatprep.subr.bf16.mxu0 %v3413_v1 }
 0xd97   :  { %1742 = vrot.lane.b32.xlu1 %v1500_v20, %s3418_s21 }
 0xd9b   :  { %1740 = vrot.lane.b32.xlu1 %v1499_v12, %s3418_s21  ;;  %3037 = vmatmul.mubr.msk.bf16.vlgmr.msra.gmra.mrb[32].mxu0 %vm478_vm5, %v1499_v12 }
 0xd9c   :  { %3048 = vmatprep.mubr.msk.bf16.mxu0 %vm3414_vm0, %v3413_v1 }
 0xd9f   :  { %1861 = vrot.lane.b32.xlu1 %v1499_v12, %s3417_s20 }
 0xdff   :  { %v1618_v29 = vpop.permute.xlu0 %1617 }
 0xe05   :  { %v1621_v26 = vpop.permute.xlu1 %1620  ;;  %v1864_v31 = vpop.permute.xlu0 %1863 }
 0xe06   :  { %v1626_v27 = vsel %vm478_vm5, %v1621_v26, 0  ;;  %v1869_v33 = vsel %vm478_vm5, %v1864_v31, 0 }
 0xe07   :  { %3047 = vmatpush3.bf16.xpose.msra.mxu0 %v1626_v27 }
 0xe08   :  { %3058 = vmatprep.subr.bf16.mxu0 %v3413_v1 }
 0xe09   :  { %v1743_v28 = vpop.permute.xlu1 %1742 }
 0xe0a   :  { %v1748_v30 = vsel %vm478_vm5, %v1743_v28, 0 }
 0xe0d   :  { %v1741_v32 = vpop.permute.xlu1 %1740 }
 0xe0e   :  { %3049 = vmatmul.mubr.msk.bf16.vlgmr.msra.gmra.mrb[36].mxu0 %vm478_vm5, %v1618_v29 }
 0xe0f   :  { %3059 = vmatpush3.bf16.xpose.msra.mxu0 %v1748_v30  ;;  %3060 = vmatprep.mubr.msk.bf16.mxu0 %vm3414_vm0, %v3413_v1 }
 0xe10   :  { %3070 = vmatprep.subr.bf16.mxu0 %v3413_v1 }
 0xe11   :  { %v1862_v35 = vpop.permute.xlu1 %1861 }
 0xe16   :  { %3061 = vmatmul.mubr.msk.bf16.vlgmr.msra.gmra.mrb[40].mxu0 %vm478_vm5, %v1741_v32 }
 0xe17   :  { %3071 = vmatpush3.bf16.xpose.msra.mxu0 %v1869_v33  ;;  %3072 = vmatprep.mubr.msk.bf16.mxu0 %vm3414_vm0, %v3413_v1 }
 0xe18   :  { %3082 = vmatprep.subr.bf16.mxu0 %v3413_v1 }
 0xe1e   :  { %3073 = vmatmul.mubr.msk.bf16.vlgmr.msra.gmra.mrb[44].mxu0 %vm478_vm5, %v1862_v35 }
 0xe1f   :  { %3086 = vmatprep.mubr.msk.bf16.mxu0 %vm3414_vm0, %v3413_v1 }
 0xe6e   :  { %v1542_v36 = vpop.f32.mrb[32].mxu0 }
 0xe6f   :  { %v1543_v37 = vadd.f32 %v1542_v36, %v3713_v61  ;;  %v3038_v38 = vpop.f32.mrb[33].mxu0 }
 0xe70   :  { %v1545_v39 = vpop.f32.mrb[34].mxu0 }
 0xe71   :  { %v1546_v40 = vadd.f32 %v1545_v39, %v3718_v63  ;;  %v3039_v51 = vpop.f32.mrb[35].mxu0  ;;  %v1549_v41 = vsel %vm526_vm6, %v1543_v37, -inf }
 0xe72   :  { %1550 = vmax.xlane.f32.xlu0 %v1549_v41 }
 0xe73   :  { %v1552_v42 = vsel %vm526_vm6, %v1546_v40, -inf }
 0xe74   :  { %1553 = vmax.xlane.f32.xlu1 %v1552_v42 }
 0xee1   :  { %v1662_v43 = vpop.f32.mrb[36].mxu0 }
 0xee2   :  { %v1663_v44 = vadd.f32 %v1662_v43, %v3713_v61  ;;  %v3050_v45 = vpop.f32.mrb[37].mxu0 }
 0xee3   :  { %v1665_v46 = vpop.f32.mrb[38].mxu0 }
 0xee4   :  { %v1666_v49 = vadd.f32 %v1665_v46, %v3718_v63  ;;  %v3051_v50 = vpop.f32.mrb[39].mxu0  ;;  %v1669_v52 = vsel %vm526_vm6, %v1663_v44, -inf }
 0xee5   :  { %1670 = vmax.xlane.f32.xlu0 %v1669_v52 }
 0xee6   :  { %v1672_v54 = vsel %vm526_vm6, %v1666_v49, -inf }
 0xee9   :  { %1673 = vmax.xlane.f32.xlu0 %v1672_v54  ;;  %v1784_v55 = vpop.f32.mrb[40].mxu0 }
 0xeea   :  { %v1785_v56 = vadd.f32 %v1784_v55, %v3713_v61  ;;  %v3062_v57 = vpop.f32.mrb[41].mxu0 }
 0xeeb   :  { %v1787_v58 = vpop.f32.mrb[42].mxu0 }
 0xeec   :  { %v1788_v59 = vadd.f32 %v1787_v58, %v3718_v63  ;;  %v3063_v60 = vpop.f32.mrb[43].mxu0  ;;  %v1791_v0 = vsel %vm526_vm6, %v1785_v56, -inf }
 0xeed   :  { %1792 = vmax.xlane.f32.xlu1 %v1791_v0 }
 0xeee   :  { %v1794_v13 = vsel %vm526_vm6, %v1788_v59, -inf }
 0xeef   :  { %1795 = vmax.xlane.f32.xlu0 %v1794_v13 }
 0xef1   :  { %v1905_v15 = vpop.f32.mrb[44].mxu0 }
 0xef2   :  { %v1906_v2 = vadd.f32 %v1905_v15, %v3713_v61  ;;  %v3074_v3 = vpop.f32.mrb[45].mxu0 }
 0xef3   :  { %v1908_v6 = vpop.f32.mrb[46].mxu0 }
 0xef4   :  { %v1909_v7 = vadd.f32 %v1908_v6, %v3718_v63  ;;  %v3075_v8 = vpop.f32.mrb[47].mxu0  ;;  %v1912_v9 = vsel %vm526_vm6, %v1906_v2, -inf }
 0xef5   :  { %1913 = vmax.xlane.f32.xlu1 %v1912_v9 }
 0xef6   :  { %v1915_v12 = vsel %vm526_vm6, %v1909_v7, -inf }
 0xef7   :  { %1916 = vmax.xlane.f32.xlu0 %v1915_v12 }
 0xeff   :  { %v1551_v23 = vpop.xlane.xlu0 %1550 }
 0xf00   :  { %v1555_v14 = vsub.f32 %v1543_v37, %v1551_v23 }
 0xf01   :  { %v1554_v22 = vpop.xlane.xlu1 %1553 }
 0xf02   :  { %v1557_v16 = vmul.f32 1.442695, %v1555_v14  ;;  %v1556_v18 = vsub.f32 %v1546_v40, %v1554_v22 }
 0xf04   :  { %3282 = vpow2.f32 %v1557_v16  ;;  %v1559_v19 = vmul.f32 1.442695, %v1556_v18 }
 0xf06   :  { %3284 = vpow2.f32 %v1559_v19 }
 0xf0e   :  { %v3283_v61 = vpop.eup %3282 }
 0xf0f   :  { %v1561_v21 = vsel %vm526_vm6, %v3283_v61, 0.0 }
 0xf10   :  { %v3285_v20 = vpop.eup %3284  ;;  %1562 = vadd.xlane.f32.xlu1 %v1561_v21 }
 0xf11   :  { %v1564_v63 = vsel %vm526_vm6, %v3285_v20, 0.0 }
 0xf12   :  { %1565 = vadd.xlane.f32.xlu0 %v1564_v63 }
 0xf21   :  { %1693 = vrot.lane.b32.xlu1 %v3910_v10, %s3416_s0 }
 0xf72   :  { %v1671_v25 = vpop.xlane.xlu0 %1670 }
 0xf73   :  { %v1675_v26 = vsub.f32 %v1663_v44, %v1671_v25 }
 0xf75   :  { %v1677_v27 = vmul.f32 1.442695, %v1675_v26 }
 0xf76   :  { %v1674_v28 = vpop.xlane.xlu0 %1673 }
 0xf77   :  { %3286 = vpow2.f32 %v1677_v27  ;;  %v1676_v29 = vsub.f32 %v1666_v49, %v1674_v28 }
 0xf79   :  { %v1679_v30 = vmul.f32 1.442695, %v1676_v29 }
 0xf7a   :  { %v1793_v31 = vpop.xlane.xlu1 %1792 }
 0xf7b   :  { %3288 = vpow2.f32 %v1679_v30  ;;  %v1797_v32 = vsub.f32 %v1785_v56, %v1793_v31 }
 0xf7c   :  { %v1796_v33 = vpop.xlane.xlu0 %1795 }
 0xf7d   :  { %v1799_v35 = vmul.f32 1.442695, %v1797_v32  ;;  %v1798_v36 = vsub.f32 %v1788_v59, %v1796_v33 }
 0xf7f   :  { %3290 = vpow2.f32 %v1799_v35  ;;  %v1801_v37 = vmul.f32 1.442695, %v1798_v36 }
 0xf81   :  { %v3287_v38 = vpop.eup %3286  ;;  %3292 = vpow2.f32 %v1801_v37 }
 0xf82   :  { %v1914_v39 = vpop.xlane.xlu1 %1913  ;;  %v1681_v40 = vsel %vm526_vm6, %v3287_v38, 0.0 }
 0xf83   :  { %v1918_v51 = vsub.f32 %v1906_v2, %v1914_v39  ;;  %1682 = vadd.xlane.f32.xlu1 %v1681_v40 }
 0xf84   :  { %v1917_v41 = vpop.xlane.xlu0 %1916 }
 0xf85   :  { %v3289_v42 = vpop.eup %3288  ;;  %v1920_v43 = vmul.f32 1.442695, %v1918_v51  ;;  %v1919_v44 = vsub.f32 %v1909_v7, %v1917_v41  ;;  %v3218_v51 = vld [vmem:[%s4159_s10 + $0x10] sm:$0xff]  }
 0xf86   :  { %v1684_v45 = vsel %vm526_vm6, %v3289_v42, 0.0  ;;  %3083 = vmatpush3.bf16.msra.mxu0 %v3218_v51 }
 0xf87   :  { %3294 = vpow2.f32 %v1920_v43  ;;  %v1922_v46 = vmul.f32 1.442695, %v1919_v44  ;;  %1685 = vadd.xlane.f32.xlu0 %v1684_v45  ;;  %3084 = vmatprep.subr.bf16.mxu0 %v3413_v1  ;;  %v3219_v45 = vld [vmem:[%s4159_s10 + $0x18] sm:$0xff]  }
 0xf89   :  { %v3291_v49 = vpop.eup %3290  ;;  %3296 = vpow2.f32 %v1922_v46 }
 0xf8a   :  { %v1803_v50 = vsel %vm526_vm6, %v3291_v49, 0.0  ;;  %3085 = vmatpush3.bf16.msra.mxu0 %v3219_v45 }
 0xf8b   :  { %v3293_v52 = vpop.eup %3292  ;;  %1804 = vadd.xlane.f32.xlu1 %v1803_v50  ;;  %3098 = vmatprep.subr.bf16.mxu0 %v3413_v1 }
 0xf8c   :  { %v1806_v54 = vsel %vm526_vm6, %v3293_v52, 0.0 }
 0xf8d   :  { %1807 = vadd.xlane.f32.xlu0 %v1806_v54 }
 0xf91   :  { %v3295_v55 = vpop.eup %3294 }
 0xf92   :  { %v1924_v56 = vsel %vm526_vm6, %v3295_v55, 0.0 }
 0xf93   :  { %v3297_v57 = vpop.eup %3296  ;;  %1925 = vadd.xlane.f32.xlu1 %v1924_v56 }
 0xf94   :  { %v1927_v58 = vsel %vm526_vm6, %v3297_v57, 0.0 }
 0xf95   :  { %1928 = vadd.xlane.f32.xlu0 %v1927_v58 }
 0xf9d   :  { %v1563_v59 = vpop.xlane.xlu1 %1562 }
 0xf9e   :  { %3298 = vrcp.f32 %v1563_v59 }
 0xf9f   :  { %v1566_v60 = vpop.xlane.xlu0 %1565 }
 0xfa0   :  { %3300 = vrcp.f32 %v1566_v60 }
 0xfa1   :  { %v1694_v6 = vpop.permute.xlu1 %1693 }
 0xfa4   :  { %1935 = vrot.lane.b32.xlu1 %v3910_v10, %s3417_s20 }
 0xfa8   :  { %v3299_v0 = vpop.eup %3298 }
 0xfa9   :  { %v1569_v15 = vmul.f32 %v3299_v0, %v3283_v61 }
 0xfaa   :  { %v3301_v13 = vpop.eup %3300 }
 0xfab   :  { %v1570_v2 = vmul.f32 %v3301_v13, %v3285_v20  ;;  %1814 = vrot.lane.b32.xlu0 %v3910_v10, %s3418_s21 }
 0xfad   :  { %v1571_v3 = vpack.c.bf16 %v1570_v2, %v1569_v15 }
 0xfaf   :  { %3043 = vmatmul.mubr.msk.bf16.vlgmr.msra.gmra.mrb[40].mxu1 %vm526_vm6, %v1571_v3 }
 0xfb0   :  { %3053 = vmatpush3.bf16.msra.mxu1 %v1694_v6  ;;  %3054 = vmatprep.mubr.msk.bf16.mxu1 %vm3414_vm0, %v3413_v1 }
 0xfb1   :  { %3064 = vmatprep.subr.bf16.mxu1 %v3413_v1 }
0x1010   :  { %v1683_v7 = vpop.xlane.xlu1 %1682 }
0x1011   :  { %3302 = vrcp.f32 %v1683_v7 }
0x1014   :  { %v1686_v8 = vpop.xlane.xlu0 %1685 }
0x1015   :  { %3304 = vrcp.f32 %v1686_v8 }
0x1018   :  { %v1805_v9 = vpop.xlane.xlu1 %1804 }
0x1019   :  { %3306 = vrcp.f32 %v1805_v9 }
0x101a   :  { %v1808_v12 = vpop.xlane.xlu0 %1807 }
0x101b   :  { %3308 = vrcp.f32 %v1808_v12  ;;  %v3303_v23 = vpop.eup %3302 }
0x101c   :  { %v1689_v14 = vmul.f32 %v3303_v23, %v3287_v38 }
0x101f   :  { %v3305_v10 = vpop.eup %3304 }
0x1020   :  { %v1690_v22 = vmul.f32 %v3305_v10, %v3289_v42  ;;  %v1926_v16 = vpop.xlane.xlu1 %1925 }
0x1021   :  { %3310 = vrcp.f32 %v1926_v16 }
0x1022   :  { %v1929_v18 = vpop.xlane.xlu0 %1928  ;;  %v1691_v19 = vpack.c.bf16 %v1690_v22, %v1689_v14  ;;  %v2021_v22 = vrot.slane %v3904_v53, %v3595_v24 }
0x1023   :  { %3312 = vrcp.f32 %v1929_v18  ;;  %v3307_v61 = vpop.eup %3306 }
0x1024   :  { %3055 = vmatmul.mubr.msk.bf16.vlgmr.msra.gmra.mrb[44].mxu1 %vm526_vm6, %v1691_v19  ;;  %v1811_v25 = vmul.f32 %v3307_v61, %v3291_v49  ;;  %v1936_v28 = vpop.permute.xlu1 %1935 }
0x1025   :  { %v3309_v21 = vpop.eup %3308  ;;  %3066 = vmatprep.mubr.msk.bf16.mxu1 %vm3414_vm0, %v3413_v1 }
0x1026   :  { %v1812_v20 = vmul.f32 %v3309_v21, %v3293_v52  ;;  %v1815_v63 = vpop.permute.xlu0 %1814 }
0x1027   :  { %3065 = vmatpush3.bf16.msra.mxu1 %v1815_v63 }
0x1028   :  { %3076 = vmatprep.subr.bf16.mxu1 %v3413_v1  ;;  %v1813_v26 = vpack.c.bf16 %v1812_v20, %v1811_v25 }
0x102b   :  { %v3311_v27 = vpop.eup %3310 }
0x102c   :  { %3067 = vmatmul.mubr.msk.bf16.vlgmr.msra.gmra.mrb[48].mxu1 %vm526_vm6, %v1813_v26  ;;  %v1932_v31 = vmul.f32 %v3311_v27, %v3295_v55 }
0x102d   :  { %v3313_v29 = vpop.eup %3312  ;;  %3077 = vmatpush3.bf16.msra.mxu1 %v1936_v28  ;;  %3078 = vmatprep.mubr.msk.bf16.mxu1 %vm3414_vm0, %v3413_v1 }
0x102e   :  { %v1933_v30 = vmul.f32 %v3313_v29, %v3297_v57  ;;  %3090 = vmatprep.subr.bf16.mxu1 %v3413_v1 }
0x1030   :  { %v1934_v32 = vpack.c.bf16 %v1933_v30, %v1932_v31 }
0x1034   :  { %3079 = vmatmul.mubr.msk.bf16.vlgmr.msra.gmra.mrb[52].mxu1 %vm526_vm6, %v1934_v32 }
0x1035   :  { %3094 = vmatprep.mubr.msk.bf16.mxu1 %vm3414_vm0, %v3413_v1 }
0x1082   :  { %v1609_v33 = vpop.f32.mrb[40].mxu1 }
0x1083   :  { %v3044_v35 = vpop.f32.mrb[41].mxu1 }
0x1084   :  { %v1612_v36 = vpop.f32.mrb[42].mxu1 }
0x1085   :  { %v3045_v37 = vpop.f32.mrb[43].mxu1 }
0x1086   :  { %v3221_v37 = vld [vmem:[%s4160_s11 + $0x18] sm:$0xff]  }
0x10f7   :  { %v1733_v38 = vpop.f32.mrb[44].mxu1 }
0x10f8   :  { %v3056_v39 = vpop.f32.mrb[45].mxu1 }
0x10f9   :  { %v1736_v40 = vpop.f32.mrb[46].mxu1 }
0x10fa   :  { %v3175_v41 = vpack.i.bf16 %v1736_v40, %v1733_v38  ;;  %v3057_v42 = vpop.f32.mrb[47].mxu1 }
0x10fc   :  { %3176 = vrot.lane.b32.xlu1 %v3175_v41, %s3419_s24 }
0x10ff   :  { %v1854_v43 = vpop.f32.mrb[48].mxu1 }
0x1100   :  { %v3068_v44 = vpop.f32.mrb[49].mxu1 }
0x1101   :  { %v1857_v46 = vpop.f32.mrb[50].mxu1  ;;  %v2109_v44 = vrot.slane %v3904_v53, %v3802_v11 }
0x1102   :  { %v3180_v49 = vpack.i.bf16 %v1857_v46, %v1854_v43  ;;  %v3069_v50 = vpop.f32.mrb[51].mxu1 }
0x1104   :  { %3181 = vrot.lane.b32.xlu0 %v3180_v49, %s3420_s26 }
0x1107   :  { %v1975_v52 = vpop.f32.mrb[52].mxu1 }
0x1108   :  { %v3080_v54 = vpop.f32.mrb[53].mxu1 }
0x1109   :  { %v1978_v55 = vpop.f32.mrb[54].mxu1 }
0x110a   :  { %v3185_v56 = vpack.i.bf16 %v1978_v55, %v1975_v52  ;;  %v3081_v57 = vpop.f32.mrb[55].mxu1  ;;  %v2115_v52 = vrot.slane %v3904_v53, %v3807_v17 }
0x110c   :  { %3186 = vrot.lane.b32.xlu1 %v3185_v56, %s3421_s27 }
0x116e   :  { %v3177_v58 = vpop.permute.xlu1 %3176 }
0x116f   :  { %v3179_v60 = vunpack.i.h.bf16 %v3177_v58  ;;  %v3178_v0 = vunpack.i.l.bf16 %v3177_v58  ;;  %v3222_v58 = vld [vmem:[%s4161_s12 + $0x20] sm:$0xff]  }
0x1171   :  { %v2007_v3 = vsel %vm478_vm5, %v1612_v36, %v3179_v60  ;;  %v2006_v6 = vsel %vm478_vm5, %v1609_v33, %v3178_v0  ;;  %v3224_v60 = vld [vmem:[%s4161_s12 + $0x30] sm:$0xff]   ;;  %v3225_v0 = vld [vmem:[%s4161_s12 + $0x38] sm:$0xff]  }
0x1176   :  { %v3182_v59 = vpop.permute.xlu0 %3181 }
0x1177   :  { %v3184_v13 = vunpack.i.h.bf16 %v3182_v59  ;;  %v3183_v15 = vunpack.i.l.bf16 %v3182_v59  ;;  %v3223_v59 = vld [vmem:[%s4161_s12 + $0x28] sm:$0xff]  }
0x1179   :  { %v2009_v9 = vsel %vm526_vm6, %v2007_v3, %v3184_v13  ;;  %v2008_v12 = vsel %vm526_vm6, %v2006_v6, %v3183_v15  ;;  %v2127_v13 = vrot.slane %v3904_v53, %v3831_v34 }
0x117e   :  { %v3187_v2 = vpop.permute.xlu1 %3186 }
0x117f   :  { %v3189_v7 = vunpack.i.h.bf16 %v3187_v2  ;;  %v3188_v8 = vunpack.i.l.bf16 %v3187_v2 }
0x1181   :  { %v2011_v23 = vsel %vm988_vm7, %v2009_v9, %v3189_v7  ;;  %v2010_v10 = vsel %vm988_vm7, %v2008_v12, %v3188_v8 }
0x1182   :  { %v2012_v14 = vpack.c.bf16 %v2011_v23, %v2010_v10 }
0x1184   :  { %3087 = vmatmul.mubr.msk.bf16.vlgmr.msra.gmra.mrb[48].mxu0 %vm240_vm4, %v2012_v14 }
0x1185   :  { %3106 = vmatprep.mubr.msk.bf16.mxu0 %vm3414_vm0, %v3413_v1  ;;  %3099 = vmatpush3.bf16.msra.mxu0 %v3222_v58 }
0x1186   :  { %3100 = vmatprep.subr.bf16.mxu0 %v3413_v1 }
0x1189   :  { %3101 = vmatpush3.bf16.msra.mxu0 %v3223_v59 }
0x118a   :  { %3102 = vmatprep.subr.bf16.mxu0 %v3413_v1 }
0x118d   :  { %3103 = vmatpush3.bf16.msra.mxu0 %v3224_v60 }
0x118e   :  { %3104 = vmatprep.subr.bf16.mxu0 %v3413_v1 }
0x1191   :  { %3105 = vmatpush3.bf16.msra.mxu0 %v3225_v0 }
0x1192   :  { %3126 = vmatprep.subr.bf16.mxu0 %v3413_v1 }
0x1257   :  { %v2071_v16 = vpop.f32.mrb[48].mxu0 }
0x1258   :  { %v2072_v18 = vadd.f32 %v2071_v16, %v2021_v22  ;;  %v3088_v19 = vpop.f32.mrb[49].mxu0 }
0x1259   :  { %v2074_v61 = vpop.f32.mrb[50].mxu0 }
0x125a   :  { %v2075_v21 = vadd.f32 %v2074_v61, %v2021_v22  ;;  %v3089_v20 = vpop.f32.mrb[51].mxu0  ;;  %v2078_v63 = vadd.f32 %v2072_v18, %v3868_v47 }
0x125c   :  { %v2080_v25 = vsel %vm240_vm4, %v2078_v63, 0.0  ;;  %v2079_v26 = vadd.f32 %v2075_v21, %v3870_v48  ;;  %v3220_v48 = vld [vmem:[%s4160_s11 + $0x10] sm:$0xff]  }
0x125d   :  { %2081 = vadd.xlane.f32.xlu0 %v2080_v25  ;;  %3091 = vmatpush3.bf16.msra.mxu1 %v3220_v48 }
0x125e   :  { %v2083_v27 = vsel %vm240_vm4, %v2079_v26, 0.0  ;;  %3092 = vmatprep.subr.bf16.mxu1 %v3413_v1 }
0x125f   :  { %2084 = vadd.xlane.f32.xlu1 %v2083_v27 }
0x1261   :  { %3093 = vmatpush3.bf16.msra.mxu1 %v3221_v37 }
0x1262   :  { %3110 = vmatprep.subr.bf16.mxu1 %v3413_v1 }
0x12ea   :  { %v2082_v28 = vpop.xlane.xlu0 %2081 }
0x12eb   :  { %v2086_v29 = vmul.f32 0.03125, %v2082_v28 }
0x12ec   :  { %v2085_v30 = vpop.xlane.xlu1 %2084 }
0x12ed   :  { %v2088_v24 = vsub.f32 %v2078_v63, %v2086_v29  ;;  %v2087_v31 = vmul.f32 0.03125, %v2085_v30 }
0x12ef   :  { %v2089_v32 = vsub.f32 %v2079_v26, %v2087_v31  ;;  %v2090_v33 = vmul.f32 %v2088_v24, %v2088_v24 }
0x12f1   :  { %v2092_v35 = vsel %vm240_vm4, %v2090_v33, 0.0  ;;  %v2091_v36 = vmul.f32 %v2089_v32, %v2089_v32 }
0x12f2   :  { %2093 = vadd.xlane.f32.xlu0 %v2092_v35 }
0x12f3   :  { %v2095_v47 = vsel %vm240_vm4, %v2091_v36, 0.0 }
0x12f6   :  { %2096 = vadd.xlane.f32.xlu0 %v2095_v47 }
0x137f   :  { %v2094_v38 = vpop.xlane.xlu0 %2093 }
0x1380   :  { %v2098_v39 = vmul.f32 0.03125, %v2094_v38 }
0x1382   :  { %v2100_v40 = vadd.f32 1e-12, %v2098_v39 }
0x1383   :  { %v2097_v51 = vpop.xlane.xlu0 %2096 }
0x1384   :  { %3314 = vrsqrt.f32 %v2100_v40  ;;  %v2099_v41 = vmul.f32 0.03125, %v2097_v51 }
0x1386   :  { %v2101_v42 = vadd.f32 1e-12, %v2099_v41 }
0x1388   :  { %3316 = vrsqrt.f32 %v2101_v42 }
0x138e   :  { %v3315_v43 = vpop.eup %3314 }
0x138f   :  { %v2104_v45 = vmul.f32 %v3315_v43, %v2088_v24  ;;  %v2215_v24 = vrot.slane %v3904_v53, %v3839_v62 }
0x1391   :  { %v2110_v49 = vmul.f32 %v2109_v44, %v2104_v45 }
0x1392   :  { %v3317_v46 = vpop.eup %3316 }
0x1393   :  { %v2105_v50 = vmul.f32 %v3317_v46, %v2089_v32  ;;  %v2116_v55 = vadd.f32 %v2115_v52, %v2110_v49 }
0x1395   :  { %v2111_v54 = vmul.f32 %v2109_v44, %v2105_v50  ;;  %v3226_v50 = vld [vmem:[#allocation2] sm:$0xff]  }
0x1397   :  { %v2117_v56 = vadd.f32 %v2115_v52, %v2111_v54  ;;  %v3227_v52 = vld [vmem:[%s4163_s14] sm:$0xff]   ;;  %v3228_v54 = vld [vmem:[#allocation2 + $0x8] sm:$0xff]  }
0x1399   :  { %v2118_v57 = vpack.c.bf16 %v2117_v56, %v2116_v55 }
0x139b   :  { %3095 = vmatmul.mubr.msk.bf16.vlgmr.msra.gmra.mrb[56].mxu1 %vm240_vm4, %v2118_v57 }
0x139c   :  { %3114 = vmatprep.mubr.msk.bf16.mxu1 %vm3414_vm0, %v3413_v1  ;;  %3111 = vmatpush3.bf16.msra.mxu1 %v3227_v52 }
0x139d   :  { %3112 = vmatprep.subr.bf16.mxu1 %v3413_v1 }
0x146e   :  { %v2177_v15 = vpop.f32.mrb[56].mxu1 }
0x146f   :  { %v2178_v2 = vadd.f32 %v2177_v15, %v2127_v13  ;;  %v3096_v3 = vpop.f32.mrb[57].mxu1 }
0x1470   :  { %v2180_v6 = vpop.f32.mrb[58].mxu1 }
0x1471   :  { %v2186_v7 = vmul.f32 0.044715, %v2178_v2  ;;  %v2181_v8 = vadd.f32 %v2180_v6, %v2127_v13  ;;  %v3097_v9 = vpop.f32.mrb[59].mxu1  ;;  %v2184_v25 = vmul.f32 0.5, %v2178_v2  ;;  %v2726_v13 = vld [vmem:[%s4162_s13 + $0x18] sm:$0x3] }
0x1472   :  { %v2315_v15 = vrot.slane %v2726_v13, %v3621_v4  ;;  %v2321_v6 = vrot.slane %v2726_v13, %v3624_v5 }
0x1473   :  { %v2188_v12 = vmul.f32 %v2186_v7, %v2178_v2  ;;  %v2187_v23 = vmul.f32 0.044715, %v2181_v8  ;;  %v2185_v26 = vmul.f32 0.5, %v2181_v8 }
0x1475   :  { %v2190_v10 = vmul.f32 %v2188_v12, %v2178_v2  ;;  %v2189_v14 = vmul.f32 %v2187_v23, %v2181_v8 }
0x1477   :  { %v2192_v22 = vadd.f32 %v2190_v10, %v2178_v2  ;;  %v2191_v16 = vmul.f32 %v2189_v14, %v2181_v8 }
0x1479   :  { %v2194_v18 = vmul.f32 0.7978846, %v2192_v22  ;;  %v2193_v19 = vadd.f32 %v2191_v16, %v2181_v8 }
0x147b   :  { %3318 = vtanh.f32 %v2194_v18  ;;  %v2195_v61 = vmul.f32 0.7978846, %v2193_v19  ;;  %v3230_v19 = vld [vmem:[%s4164_s15] sm:$0xff]  }
0x147d   :  { %3320 = vtanh.f32 %v2195_v61  ;;  %v3231_v61 = vld [vmem:[%s4164_s15 + $0x8] sm:$0xff]  }
0x1485   :  { %v3319_v21 = vpop.eup %3318 }
0x1486   :  { %v2198_v20 = vadd.f32 1.0, %v3319_v21  ;;  %v4094_v21 = vld [vmem:[%s4155_s6] sm:$0xff] }
0x1487   :  { %v3321_v63 = vpop.eup %3320 }
0x1488   :  { %v2199_v27 = vadd.f32 1.0, %v3321_v63  ;;  %v2200_v28 = vmul.f32 %v2198_v20, %v2184_v25  ;;  %v2470_v20 = vrot.slane %v4094_v21, %v3807_v17  ;;  %v2341_v25 = vrot.slane %v4094_v21, %v3802_v11 }
0x148a   :  { %v2201_v29 = vmul.f32 %v2199_v27, %v2185_v26 }
0x148c   :  { %v2202_v30 = vpack.c.bf16 %v2201_v29, %v2200_v28 }
0x148e   :  { %3107 = vmatmul.mubr.msk.bf16.vlgmr.msra.gmra.mrb[52].mxu0 %vm1216_vm8, %v2202_v30 }
0x148f   :  { %3130 = vmatprep.mubr.msk.bf16.mxu0 %vm3414_vm0, %v3413_v1  ;;  %3127 = vmatpush3.bf16.msra.mxu0 %v3226_v50 }
0x1490   :  { %3128 = vmatprep.subr.bf16.mxu0 %v3413_v1 }
0x1493   :  { %3129 = vmatpush3.bf16.msra.mxu0 %v3228_v54 }
0x1561   :  { %v2277_v31 = vpop.f32.mrb[52].mxu0 }
0x1562   :  { %v2278_v32 = vadd.f32 %v2277_v31, %v2215_v24  ;;  %v3108_v33 = vpop.f32.mrb[53].mxu0 }
0x1563   :  { %v2280_v35 = vpop.f32.mrb[54].mxu0 }
0x1564   :  { %v2281_v36 = vadd.f32 %v2280_v35, %v2215_v24  ;;  %v3109_v47 = vpop.f32.mrb[55].mxu0  ;;  %v2284_v48 = vadd.f32 %v2278_v32, %v2116_v55  ;;  %v3229_v55 = vld [vmem:[%s4163_s14 + $0x8] sm:$0xff]  }
0x1565   :  { %3113 = vmatpush3.bf16.msra.mxu1 %v3229_v55 }
0x1566   :  { %v2286_v37 = vsel %vm240_vm4, %v2284_v48, 0.0  ;;  %v2285_v38 = vadd.f32 %v2281_v36, %v2117_v56  ;;  %3118 = vmatprep.subr.bf16.mxu1 %v3413_v1 }
0x1567   :  { %2287 = vadd.xlane.f32.xlu1 %v2286_v37 }
0x1568   :  { %v2289_v39 = vsel %vm240_vm4, %v2285_v38, 0.0 }
0x1569   :  { %2290 = vadd.xlane.f32.xlu0 %v2289_v39 }
0x15f4   :  { %v2288_v40 = vpop.xlane.xlu1 %2287 }
0x15f5   :  { %v2292_v51 = vmul.f32 0.03125, %v2288_v40 }
0x15f6   :  { %v2291_v41 = vpop.xlane.xlu0 %2290 }
0x15f7   :  { %v2294_v42 = vsub.f32 %v2284_v48, %v2292_v51  ;;  %v2293_v43 = vmul.f32 0.03125, %v2291_v41 }
0x15f9   :  { %v2295_v53 = vsub.f32 %v2285_v38, %v2293_v43  ;;  %v2296_v44 = vmul.f32 %v2294_v42, %v2294_v42 }
0x15fb   :  { %v2298_v45 = vsel %vm240_vm4, %v2296_v44, 0.0  ;;  %v2297_v46 = vmul.f32 %v2295_v53, %v2295_v53 }
0x15fc   :  { %2299 = vadd.xlane.f32.xlu1 %v2298_v45 }
0x15fd   :  { %v2301_v49 = vsel %vm240_vm4, %v2297_v46, 0.0 }
0x15fe   :  { %2302 = vadd.xlane.f32.xlu0 %v2301_v49 }
0x1689   :  { %v2300_v56 = vpop.xlane.xlu1 %2299 }
0x168a   :  { %v2304_v57 = vmul.f32 0.03125, %v2300_v56 }
0x168b   :  { %v2303_v58 = vpop.xlane.xlu0 %2302 }
0x168c   :  { %v2306_v59 = vadd.f32 1e-12, %v2304_v57  ;;  %v2305_v60 = vmul.f32 0.03125, %v2303_v58 }
0x168e   :  { %3322 = vrsqrt.f32 %v2306_v59  ;;  %v2307_v0 = vadd.f32 1e-12, %v2305_v60 }
0x1690   :  { %3324 = vrsqrt.f32 %v2307_v0 }
0x1698   :  { %v3323_v2 = vpop.eup %3322 }
0x1699   :  { %v2310_v3 = vmul.f32 %v3323_v2, %v2294_v42 }
0x169a   :  { %v3325_v7 = vpop.eup %3324 }
0x169b   :  { %v2316_v8 = vmul.f32 %v2315_v15, %v2310_v3  ;;  %v2311_v9 = vmul.f32 %v3325_v7, %v2295_v53  ;;  %v3233_v7 = vld [vmem:[%s4154_s5 + $0x8] sm:$0xff]  }
0x169d   :  { %v2317_v12 = vmul.f32 %v2315_v15, %v2311_v9  ;;  %v2322_v23 = vadd.f32 %v2321_v6, %v2316_v8  ;;  %v77_v8 = vld [vmem:[%s4155_s6 + $0x8] sm:$0x3] }
0x169e   :  { %v2406_v9 = vrot.slane %v77_v8, %v3621_v4 }
0x169f   :  { %v2323_v10 = vadd.f32 %v2321_v6, %v2317_v12  ;;  %2783 = vst.msk [vmem:[%s4166_s17 + $0x20] sm:$0xff] %vm240_vm4, %v2322_v23  ;;  %v3232_v6 = vld [vmem:[%s4154_s5] sm:$0xff]   ;;  %s3422_s5 = smov [#allocation6]  }
0x16a0   :  { %s2670_s6 = sshll.u32 %s3422_s5, 4  ;;  %s2671_s6 = int_to_ptr.vmem [resolvable:$true] %s2670_s6 }
0x16a1   :  { %2784 = vst.msk [vmem:[%s4166_s17 + $0x28] sm:$0xff] %vm240_vm4, %v2323_v10  ;;  %v2327_v14 = vpack.c.bf16 %v2323_v10, %v2322_v23  ;;  %v2329_v22 = vrot.slane %v2323_v10, 7  ;;  %s3359_s3 = scalar_lea.vmem %s2671_s6, 32  ;;  %p3364_p9 = scmp.lt.s32.totalorder %s2671_s6, %s2671_s6 }
0x16a2   :  { %p3360_p8 = scmp.ne.s32.totalorder %s2671_s6, %s3359_s3  ;;  %p3365_p10 = scmp.lt.s32.totalorder %s3359_s3, %s3359_s3 }
0x16a3   :  { %3131 = vmatmul.mubr.msk.bf16.vlgmr.msra.gmra.mrb[56].mxu0 %vm240_vm4, %v2327_v14  ;;  %v2332_v16 = vsel %vm2331_vm9, %v2322_v23, %v2329_v22 }
0x16a4   :  { %v2333_v18 = vpack.c.bf16 %v2332_v16, %v2332_v16  ;;  %p3366_p11 = por %p3365_p10, %p3364_p9 }
0x16a6   :  { %3115 = vmatmul.mubr.msk.bf16.vlgmr.msra.gmra.mrb[60].mxu1 %vm240_vm4, %v2333_v18  ;;  %p3367_p12 = pnand %p3366_p11, %p3360_p8 }
0x16a7   :  { %3122 = vmatprep.mubr.msk.bf16.mxu1 %vm3414_vm0, %v3413_v1  ;;  %3119 = vmatpush3.bf16.msra.mxu1 %v3230_v19 }
0x16a8   :  { %3120 = vmatprep.subr.bf16.mxu1 %v3413_v1 }
0x16ab   :  { %3121 = vmatpush3.bf16.msra.mxu1 %v3231_v61 }
0x16ac   :  { %3134 = vmatprep.subr.bf16.mxu1 %v3413_v1 }
0x1776   :  { %v2520_v63 = vpop.f32.mrb[56].mxu0 }
0x1777   :  { %v2521_v26 = vadd.f32 %v2520_v63, %v2470_v20  ;;  %v3132_v27 = vpop.f32.mrb[57].mxu0  ;;  %v2574_v63 = vrot.slane %v4094_v21, %v3831_v34 }
0x1778   :  { %v2523_v28 = vpop.f32.mrb[58].mxu0  ;;  %v2580_v27 = vrot.slane %v4094_v21, %v3839_v62 }
0x1779   :  { %v2529_v29 = vmul.f32 0.044715, %v2521_v26  ;;  %v2524_v30 = vadd.f32 %v2523_v28, %v2470_v20  ;;  %v2391_v24 = vpop.f32.mrb[60].mxu1  ;;  %v3133_v31 = vpop.f32.mrb[59].mxu0  ;;  %v2527_v53 = vmul.f32 0.5, %v2521_v26 }
0x177a   :  { %v2392_v32 = vadd.f32 %v2391_v24, %v2341_v25  ;;  %v3116_v33 = vpop.f32.mrb[61].mxu1 }
0x177b   :  { %v2530_v35 = vmul.f32 0.044715, %v2524_v30  ;;  %v2394_v36 = vpop.f32.mrb[62].mxu1  ;;  %v2531_v47 = vmul.f32 %v2529_v29, %v2521_v26  ;;  %v2528_v49 = vmul.f32 0.5, %v2524_v30 }
0x177c   :  { %3326 = vtanh.f32 %v2392_v32  ;;  %v3117_v48 = vpop.f32.mrb[63].mxu1 }
0x177d   :  { %v2533_v37 = vmul.f32 %v2531_v47, %v2521_v26  ;;  %v2532_v17 = vmul.f32 %v2530_v35, %v2524_v30 }
0x177f   :  { %v2535_v38 = vadd.f32 %v2533_v37, %v2521_v26  ;;  %v2534_v39 = vmul.f32 %v2532_v17, %v2524_v30 }
0x1781   :  { %v2537_v40 = vmul.f32 0.7978846, %v2535_v38  ;;  %v2536_v11 = vadd.f32 %v2534_v39, %v2524_v30 }
0x1783   :  { %3328 = vtanh.f32 %v2537_v40  ;;  %v2538_v51 = vmul.f32 0.7978846, %v2536_v11 }
0x1785   :  { %3330 = vtanh.f32 %v2538_v51 }
0x1786   :  { %v3327_v41 = vpop.eup %3326 }
0x1787   :  { %v2398_v42 = vpack.c.bf16 %v3327_v41, %v3327_v41 }
0x1789   :  { %3123 = vmatmul.mubr.msk.bf16.vlgmr.msra.gmra.mrb[64].mxu1 %vm240_vm4, %v2398_v42 }
0x178a   :  { %3138 = vmatprep.mubr.msk.bf16.mxu1 %vm3414_vm0, %v3413_v1  ;;  %3135 = vmatpush3.bf16.msra.mxu1 %v3232_v6 }
0x178b   :  { %3136 = vmatprep.subr.bf16.mxu1 %v3413_v1 }
0x178d   :  { %v3329_v43 = vpop.eup %3328 }
0x178e   :  { %v2541_v44 = vadd.f32 1.0, %v3329_v43  ;;  %3137 = vmatpush3.bf16.msra.mxu1 %v3233_v7 }
0x178f   :  { %v3331_v45 = vpop.eup %3330 }
0x1790   :  { %v2543_v46 = vmul.f32 %v2541_v44, %v2527_v53  ;;  %v2542_v50 = vadd.f32 1.0, %v3331_v45 }
0x1792   :  { %v2545_v52 = vsel %vm240_vm4, %v2543_v46, 0.0  ;;  %v2544_v54 = vmul.f32 %v2542_v50, %v2528_v49 }
0x1793   :  { %2546 = vadd.xlane.f32.xlu1 %v2545_v52 }
0x1794   :  { %v2548_v55 = vsel %vm240_vm4, %v2544_v54, 0.0 }
0x1795   :  { %2549 = vadd.xlane.f32.xlu0 %v2548_v55 }
0x1820   :  { %v2547_v56 = vpop.xlane.xlu1 %2546 }
0x1821   :  { %v2551_v57 = vmul.f32 0.03125, %v2547_v56 }
0x1822   :  { %v2550_v58 = vpop.xlane.xlu0 %2549 }
0x1823   :  { %v2553_v59 = vsub.f32 %v2543_v46, %v2551_v57  ;;  %v2552_v60 = vmul.f32 0.03125, %v2550_v58 }
0x1825   :  { %v2554_v0 = vsub.f32 %v2544_v54, %v2552_v60  ;;  %v2555_v13 = vmul.f32 %v2553_v59, %v2553_v59 }
0x1827   :  { %v2557_v15 = vsel %vm240_vm4, %v2555_v13, 0.0  ;;  %v2556_v2 = vmul.f32 %v2554_v0, %v2554_v0 }
0x1828   :  { %2558 = vadd.xlane.f32.xlu1 %v2557_v15 }
0x1829   :  { %v2560_v3 = vsel %vm240_vm4, %v2556_v2, 0.0 }
0x182a   :  { %2561 = vadd.xlane.f32.xlu0 %v2560_v3 }
0x185c   :  { %v2456_v12 = vpop.f32.mrb[64].mxu1 }
0x185d   :  { %v2457_v23 = vadd.f32 %v2456_v12, %v2406_v9  ;;  %v3124_v10 = vpop.f32.mrb[65].mxu1 }
0x185e   :  { %v2459_v14 = vpop.f32.mrb[66].mxu1 }
0x185f   :  { %2462 = vst [vmem:[#allocation6] sm:$0x3] %v2457_v23  ;;  %v3125_v22 = vpop.f32.mrb[67].mxu1 }
0x18b5   :  { %v2559_v16 = vpop.xlane.xlu1 %2558 }
0x18b6   :  { %v2563_v18 = vmul.f32 0.03125, %v2559_v16 }
0x18b7   :  { %v2562_v19 = vpop.xlane.xlu0 %2561 }
0x18b8   :  { %v2565_v61 = vadd.f32 1e-12, %v2563_v18  ;;  %v2564_v20 = vmul.f32 0.03125, %v2562_v19 }
0x18ba   :  { %3332 = vrsqrt.f32 %v2565_v61  ;;  %v2566_v1 = vadd.f32 1e-12, %v2564_v20 }
0x18bc   :  { %3334 = vrsqrt.f32 %v2566_v1 }
0x18c4   :  { %v3333_v25 = vpop.eup %3332 }
0x18c5   :  { %v2569_v26 = vmul.f32 %v3333_v25, %v2553_v59 }
0x18c6   :  { %v3335_v4 = vpop.eup %3334 }
0x18c7   :  { %v2575_v28 = vmul.f32 %v2574_v63, %v2569_v26  ;;  %v2570_v29 = vmul.f32 %v3335_v4, %v2554_v0 }
0x18c9   :  { %v2576_v30 = vmul.f32 %v2574_v63, %v2570_v29  ;;  %v2581_v24 = vadd.f32 %v2580_v27, %v2575_v28 }
0x18cb   :  { %v2582_v31 = vadd.f32 %v2580_v27, %v2576_v30 }
0x18cd   :  { %v2583_v32 = vpack.c.bf16 %v2582_v31, %v2581_v24 }
0x18cf   :  { %3139 = vmatmul.mubr.msk.bf16.vlgmr.msra.gmra.mrb[68].mxu1 %vm240_vm4, %v2583_v32 }
0x18d0   :  { %3370 = shalt.err (!%p3367_p12)
}
0x18d1   :  { %s3371_s1 = scalar_lea.hbm %s4168_s19, 32 }
0x18d2   :  { %p3372_p13 = scmp.ne.s32.totalorder %s4168_s19, %s3371_s1  ;;  %p3375_p0 = scmp.lt.u32.totalorder %s3371_s1, %s4168_s19 }
0x18d4   :  { %p3377_p1 = pnand %p3375_p0, %p3372_p13 }
0x18d6   :  { %3380 = shalt.err (!%p3377_p1)
}
0x18d7   :  { %2673 = dma.vmem_to_hbm [thread:$0]  %s2671_s6, 32, %s4168_s19, [#allocation7]   ;;  %v2591_v34 = vrot.slane %v77_v8, %v3624_v5 }
0x18d8   :  { %s3423_s14 = smov [#allocation5]  }
0x18d9   :  { %s2657_s8 = sshll.u32 %s3423_s14, 4  ;;  %s2658_s8 = int_to_ptr.vmem [resolvable:$true] %s2657_s8 }
0x18da   :  { %s3381_s13 = scalar_lea.vmem %s2658_s8, 256  ;;  %p3386_p3 = scmp.lt.s32.totalorder %s2658_s8, %s2658_s8 }
0x18db   :  { %p3382_p2 = scmp.ne.s32.totalorder %s2658_s8, %s3381_s13  ;;  %p3387_p4 = scmp.lt.s32.totalorder %s3381_s13, %s3381_s13 }
0x18dd   :  { %p3388_p5 = por %p3387_p4, %p3386_p3 }
0x18df   :  { %p3389_p6 = pnand %p3388_p5, %p3382_p2 }
0x19a2   :  { %v2641_v62 = vpop.f32.mrb[68].mxu1 }
0x19a3   :  { %v2642_v21 = vadd.f32 %v2641_v62, %v2591_v34  ;;  %v3140_v33 = vpop.f32.mrb[69].mxu1 }
0x19a4   :  { %v2644_v35 = vpop.f32.mrb[70].mxu1 }
0x19a5   :  { %2648 = vst [vmem:[#allocation5] sm:$0xff] %v2642_v21  ;;  %v2645_v36 = vadd.f32 %v2644_v35, %v2591_v34  ;;  %v3141_v47 = vpop.f32.mrb[71].mxu1 }
0x19a7   :  { %2649 = vst [vmem:[#allocation5 + $0x8] sm:$0xff] %v2645_v36 }
0x19a8   :  { %3392 = shalt.err (!%p3389_p6)
}
0x19a9   :  { %s3393_s20 = scalar_lea.hbm %s4167_s18, 256 }
0x19aa   :  { %p3394_p7 = scmp.ne.s32.totalorder %s4167_s18, %s3393_s20  ;;  %p3397_p8 = scmp.lt.u32.totalorder %s3393_s20, %s4167_s18 }
0x19ac   :  { %p3399_p9 = pnand %p3397_p8, %p3394_p7 }
0x19ae   :  { %3402 = shalt.err (!%p3399_p9)
}
0x19af   :  { %s3424_s27 = smov 128  }
0x19b0   :  { %2663 = dma.vmem_to_hbm [thread:$0]  %s2658_s8, 256, %s4167_s18, [#allocation4], %s3424_s27, %s3424_s27, %s3419_s24  }
0x19b1   :  { %3405 = dma.done.wait [#allocation4], 256  }
0x19b2   :  { %3406 = vsyncadd [#allocation4], 4294967040 }
0x19b3   :  { %3407 = dma.done.wait [#allocation7], 32  }
0x19b4   :  { %3408 = vsyncadd [#allocation7], 4294967264 }
0x19b5   :  { %2682 = vsyncpa [#allocation3], 1 }
0x19b6   :  { %2683 = vsyncpa [#allocation4], 1 }
0x19b7   :  { %2684 = vsyncpa [#allocation7], 1 }

</bundles_post_ra>
